<compile_context>
chip_gen: v5e
topology: v5e:2x2
jax: 0.10.0
libtpu: 0.0.40
codegen_flags: <defaults>
</compile_context>

<pallas_src>
import jax
import jax.numpy as jnp
from jax.experimental import pallas as pl
from jax.experimental.pallas import tpu as pltpu

B, D_IN, HID, LATENT = 8, 512, 256, 256      # latent must be 256 (BatchNorm1d(256))
BN_EPS = 1e-5
BN_GAMMA = 0.5                               # mu_bn.weight.fill_(0.5), frozen
BN_BETA = 0.0                                # default BatchNorm1d bias init

# Packed bias/affine slab layout (lane offsets, all multiples of 128).
_OFF_B1E = 0
_OFF_BMV = _OFF_B1E + HID            # 256  (width 2*LATENT: [bm | bv])
_OFF_GAMMA = _OFF_BMV + 2 * LATENT   # 768
_OFF_BETA = _OFF_GAMMA + LATENT      # 1024
_OFF_B1D = _OFF_BETA + LATENT        # 1280
_OFF_B2D = _OFF_B1D + HID            # 1536
BIAS_TOTAL = _OFF_B2D + D_IN         # 2048


def vae_kernel(x_ref, eps_ref, w1e_ref, wmv_ref, w1d_ref, w2d_ref, bias_ref,
               xhat_ref, lat_ref):
    # Static, lane-aligned views into the packed f32 bias/affine slab.
    b1e = bias_ref[:, _OFF_B1E:_OFF_B1E + HID]
    bmv = bias_ref[:, _OFF_BMV:_OFF_BMV + 2 * LATENT]
    gamma = bias_ref[:, _OFF_GAMMA:_OFF_GAMMA + LATENT]
    beta = bias_ref[:, _OFF_BETA:_OFF_BETA + LATENT]
    b1d = bias_ref[:, _OFF_B1D:_OFF_B1D + HID]
    b2d = bias_ref[:, _OFF_B2D:_OFF_B2D + D_IN]

    # ---- Encoder: bf16 operands on the MXU, f32 accumulation & elementwise ----
    h = jnp.maximum(
        jnp.dot(x_ref[...], w1e_ref[...], preferred_element_type=jnp.float32) + b1e,
        0.0)
    # Fused mean / log_var heads: one (HID, 2*LATENT) matmul, slice lanes after.
    mv = jnp.dot(h.astype(jnp.bfloat16), wmv_ref[...],
                 preferred_element_type=jnp.float32) + bmv
    mean_raw = mv[:, :LATENT]
    log_var = mv[:, LATENT:]

    # ---- self.mu_bn: BatchNorm1d(256), training-mode forward (batch stats,
    # biased variance), frozen gamma=0.5.  All in f32 (v5e has no bf16 VPU/EUP).
    # TODO(synk): running_mean/var update (eval-mode parity) not implemented.
    mu_b = jnp.mean(mean_raw, axis=0, keepdims=True)
    var_b = jnp.mean((mean_raw - mu_b) ** 2, axis=0, keepdims=True)
    mean_bn = gamma * (mean_raw - mu_b) * jax.lax.rsqrt(var_b + BN_EPS) + beta

    # ---- reparameterization: z = mean + exp(0.5 * log_var) * epsilon (f32, EUP)
    z = mean_bn + jnp.exp(0.5 * log_var) * eps_ref[...]

    # ---- Decoder: x_hat = sigmoid(relu(z W1d + b1d) W2d + b2d) ----
    hd = jnp.maximum(
        jnp.dot(z.astype(jnp.bfloat16), w1d_ref[...],
                preferred_element_type=jnp.float32) + b1d,
        0.0)
    logits = jnp.dot(hd.astype(jnp.bfloat16), w2d_ref[...],
                     preferred_element_type=jnp.float32) + b2d
    xhat_ref[...] = jax.nn.sigmoid(logits)

    # Packed latent output slab: [ mean_bn | log_var | z ] along the lane axis.
    lat_ref[:, 0:LATENT] = mean_bn
    lat_ref[:, LATENT:2 * LATENT] = log_var
    lat_ref[:, 2 * LATENT:3 * LATENT] = z


def make_params():
    """Deterministic synthetic parameters (bf16 weights, packed f32 biases)."""
    k = jax.random.PRNGKey(42)
    ks = jax.random.split(k, 5)
    scale = lambda fan_in: 1.0 / jnp.sqrt(jnp.float32(fan_in))
    w1e = (jax.random.normal(ks[0], (D_IN, HID), jnp.float32)
           * scale(D_IN)).astype(jnp.bfloat16)
    wm = jax.random.normal(ks[1], (HID, LATENT), jnp.float32) * scale(HID)
    wv = jax.random.normal(ks[2], (HID, LATENT), jnp.float32) * scale(HID)
    wmv = jnp.concatenate([wm, wv], axis=1).astype(jnp.bfloat16)
    w1d = (jax.random.normal(ks[3], (LATENT, HID), jnp.float32)
           * scale(LATENT)).astype(jnp.bfloat16)
    w2d = (jax.random.normal(ks[4], (HID, D_IN), jnp.float32)
           * scale(HID)).astype(jnp.bfloat16)

    bias = jnp.zeros((1, BIAS_TOTAL), jnp.float32)      # all linear biases = 0
    bias = bias.at[0, _OFF_GAMMA:_OFF_GAMMA + LATENT].set(BN_GAMMA)
    bias = bias.at[0, _OFF_BETA:_OFF_BETA + LATENT].set(BN_BETA)
    return (w1e, wmv, w1d, w2d, bias)


def vae_forward(x, eps, params):
    w1e, wmv, w1d, w2d, bias = params
    vmem = pl.BlockSpec(memory_space=pltpu.MemorySpace.VMEM)

    weight_elems = D_IN * HID + HID * 2 * LATENT + LATENT * HID + HID * D_IN
    cost = pl.CostEstimate(
        flops=2 * B * weight_elems,
        transcendentals=B * (LATENT + D_IN),          # exp + sigmoid
        bytes_accessed=(2 * weight_elems              # bf16 weights
                        + 2 * B * D_IN                # x (bf16)
                        + 4 * B * LATENT              # eps (f32)
                        + 4 * BIAS_TOTAL              # bias slab
                        + 4 * B * D_IN                # x_hat
                        + 4 * B * 3 * LATENT),        # latent slab
    )

    x_hat, lat = pl.pallas_call(
        vae_kernel,
        out_shape=(
            jax.ShapeDtypeStruct((B, D_IN), jnp.float32),        # x_hat
            jax.ShapeDtypeStruct((B, 3 * LATENT), jnp.float32),  # [mean|log_var|z]
        ),
        in_specs=[vmem] * 7,
        out_specs=(vmem, vmem),
        cost_estimate=cost,
    )(x.astype(jnp.bfloat16), eps, w1e, wmv, w1d, w2d, bias)

    mean = lat[:, :LATENT]
    log_var = lat[:, LATENT:2 * LATENT]
    z = lat[:, 2 * LATENT:]
    return x_hat, mean, log_var, z


if __name__ == "__main__":
    key = jax.random.PRNGKey(0)
    kx, keps = jax.random.split(key)
    x = jax.random.normal(kx, (B, D_IN), jnp.float32)
    # epsilon ~ N(0, 1): the torch.randn_like draw inside reparameterization()
    eps = jax.random.normal(keps, (B, LATENT), jnp.float32)

    params = make_params()
    x_hat, mean, log_var, z = jax.block_until_ready(vae_forward(x, eps, params))

    assert x_hat.shape == (B, D_IN)
    assert mean.shape == (B, LATENT)
    assert log_var.shape == (B, LATENT)
    assert z.shape == (B, LATENT)
    assert bool(jnp.all(jnp.isfinite(x_hat)))
    print("KERNEL_OK")
</pallas_src>

<mosaic_0001>
module attributes {stable_mosaic.version = 11 : i64} {
  func.func @vae_kernel(%arg0: memref<8x512xbf16, #tpu.memory_space<vmem>>, %arg1: memref<8x256xf32, #tpu.memory_space<vmem>>, %arg2: memref<512x256xbf16, #tpu.memory_space<vmem>>, %arg3: memref<256x512xbf16, #tpu.memory_space<vmem>>, %arg4: memref<256x256xbf16, #tpu.memory_space<vmem>>, %arg5: memref<256x512xbf16, #tpu.memory_space<vmem>>, %arg6: memref<1x2048xf32, #tpu.memory_space<vmem>>, %arg7: memref<8x512xf32, #tpu.memory_space<vmem>>, %arg8: memref<8x768xf32, #tpu.memory_space<vmem>>) attributes {dimension_semantics = [], scalar_prefetch = 0 : i64, scratch_operands = 0 : i64, tpu.core_type = #tpu.core_type<tc>} {
    %c0 = arith.constant 0 : index
    %c0_0 = arith.constant 0 : index
    %0 = vector.load %arg6[%c0, %c0_0] : memref<1x2048xf32, #tpu.memory_space<vmem>>, vector<1x256xf32>
    %c0_1 = arith.constant 0 : index
    %c256 = arith.constant 256 : index
    %1 = vector.load %arg6[%c0_1, %c256] : memref<1x2048xf32, #tpu.memory_space<vmem>>, vector<1x512xf32>
    %c0_2 = arith.constant 0 : index
    %c768 = arith.constant 768 : index
    %2 = vector.load %arg6[%c0_2, %c768] : memref<1x2048xf32, #tpu.memory_space<vmem>>, vector<1x256xf32>
    %c0_3 = arith.constant 0 : index
    %c1024 = arith.constant 1024 : index
    %3 = vector.load %arg6[%c0_3, %c1024] : memref<1x2048xf32, #tpu.memory_space<vmem>>, vector<1x256xf32>
    %c0_4 = arith.constant 0 : index
    %c1280 = arith.constant 1280 : index
    %4 = vector.load %arg6[%c0_4, %c1280] : memref<1x2048xf32, #tpu.memory_space<vmem>>, vector<1x256xf32>
    %c0_5 = arith.constant 0 : index
    %c1536 = arith.constant 1536 : index
    %5 = vector.load %arg6[%c0_5, %c1536] : memref<1x2048xf32, #tpu.memory_space<vmem>>, vector<1x512xf32>
    %c0_6 = arith.constant 0 : index
    %c0_7 = arith.constant 0 : index
    %6 = vector.load %arg0[%c0_6, %c0_7] : memref<8x512xbf16, #tpu.memory_space<vmem>>, vector<8x512xbf16>
    %c0_8 = arith.constant 0 : index
    %c0_9 = arith.constant 0 : index
    %7 = vector.load %arg2[%c0_8, %c0_9] : memref<512x256xbf16, #tpu.memory_space<vmem>>, vector<512x256xbf16>
    %cst = arith.constant dense<0.000000e+00> : vector<8x256xf32>
    %8 = tpu.matmul %6, %7, %cst {dimension_numbers = #tpu.dot_dimension_numbers<[1], [0], [0], [1], [0, 0, 1, 1], [], []>} : vector<8x512xbf16>, vector<512x256xbf16>, vector<8x256xf32> -> vector<8x256xf32>
    %9 = vector.broadcast %0 : vector<1x256xf32> to vector<8x256xf32>
    %10 = arith.addf %8, %9 : vector<8x256xf32>
    %cst_10 = arith.constant 0.000000e+00 : f32
    %11 = vector.broadcast %cst_10 : f32 to vector<8x256xf32>
    %12 = arith.maximumf %10, %11 : vector<8x256xf32>
    %13 = arith.truncf %12 : vector<8x256xf32> to vector<8x256xbf16>
    %c0_11 = arith.constant 0 : index
    %c0_12 = arith.constant 0 : index
    %14 = vector.load %arg3[%c0_11, %c0_12] : memref<256x512xbf16, #tpu.memory_space<vmem>>, vector<256x512xbf16>
    %cst_13 = arith.constant dense<0.000000e+00> : vector<8x512xf32>
    %15 = tpu.matmul %13, %14, %cst_13 {dimension_numbers = #tpu.dot_dimension_numbers<[1], [0], [0], [1], [0, 0, 1, 1], [], []>} : vector<8x256xbf16>, vector<256x512xbf16>, vector<8x512xf32> -> vector<8x512xf32>
    %16 = vector.broadcast %1 : vector<1x512xf32> to vector<8x512xf32>
    %17 = arith.addf %15, %16 : vector<8x512xf32>
    %18 = vector.extract_strided_slice %17 {offsets = [0, 0], sizes = [8, 256], strides = [1, 1]} : vector<8x512xf32> to vector<8x256xf32>
    %19 = vector.extract_strided_slice %17 {offsets = [0, 256], sizes = [8, 256], strides = [1, 1]} : vector<8x512xf32> to vector<8x256xf32>
    %cst_14 = arith.constant dense<0.000000e+00> : vector<256xf32>
    %20 = vector.multi_reduction <add>, %18, %cst_14 [0] : vector<8x256xf32> to vector<256xf32>
    %21 = vector.shape_cast %20 : vector<256xf32> to vector<1x256xf32>
    %cst_15 = arith.constant 8.000000e+00 : f32
    %22 = vector.broadcast %cst_15 : f32 to vector<1x256xf32>
    %23 = arith.divf %21, %22 : vector<1x256xf32>
    %24 = vector.broadcast %23 : vector<1x256xf32> to vector<8x256xf32>
    %25 = arith.subf %18, %24 : vector<8x256xf32>
    %26 = arith.mulf %25, %25 : vector<8x256xf32>
    %cst_16 = arith.constant dense<0.000000e+00> : vector<256xf32>
    %27 = vector.multi_reduction <add>, %26, %cst_16 [0] : vector<8x256xf32> to vector<256xf32>
    %28 = vector.shape_cast %27 : vector<256xf32> to vector<1x256xf32>
    %cst_17 = arith.constant 8.000000e+00 : f32
    %29 = vector.broadcast %cst_17 : f32 to vector<1x256xf32>
    %30 = arith.divf %28, %29 : vector<1x256xf32>
    %31 = vector.broadcast %23 : vector<1x256xf32> to vector<8x256xf32>
    %32 = arith.subf %18, %31 : vector<8x256xf32>
    %33 = vector.broadcast %2 : vector<1x256xf32> to vector<8x256xf32>
    %34 = arith.mulf %33, %32 : vector<8x256xf32>
    %cst_18 = arith.constant 9.99999974E-6 : f32
    %35 = vector.broadcast %cst_18 : f32 to vector<1x256xf32>
    %36 = arith.addf %30, %35 : vector<1x256xf32>
    %37 = math.rsqrt %36 : vector<1x256xf32>
    %38 = vector.broadcast %37 : vector<1x256xf32> to vector<8x256xf32>
    %39 = arith.mulf %34, %38 : vector<8x256xf32>
    %40 = vector.broadcast %3 : vector<1x256xf32> to vector<8x256xf32>
    %41 = arith.addf %39, %40 : vector<8x256xf32>
    %cst_19 = arith.constant 5.000000e-01 : f32
    %42 = vector.broadcast %cst_19 : f32 to vector<8x256xf32>
    %43 = arith.mulf %42, %19 : vector<8x256xf32>
    %44 = math.exp %43 : vector<8x256xf32>
    %c0_20 = arith.constant 0 : index
    %c0_21 = arith.constant 0 : index
    %45 = vector.load %arg1[%c0_20, %c0_21] : memref<8x256xf32, #tpu.memory_space<vmem>>, vector<8x256xf32>
    %46 = arith.mulf %44, %45 : vector<8x256xf32>
    %47 = arith.addf %41, %46 : vector<8x256xf32>
    %48 = arith.truncf %47 : vector<8x256xf32> to vector<8x256xbf16>
    %c0_22 = arith.constant 0 : index
    %c0_23 = arith.constant 0 : index
    %49 = vector.load %arg4[%c0_22, %c0_23] : memref<256x256xbf16, #tpu.memory_space<vmem>>, vector<256x256xbf16>
    %cst_24 = arith.constant dense<0.000000e+00> : vector<8x256xf32>
    %50 = tpu.matmul %48, %49, %cst_24 {dimension_numbers = #tpu.dot_dimension_numbers<[1], [0], [0], [1], [0, 0, 1, 1], [], []>} : vector<8x256xbf16>, vector<256x256xbf16>, vector<8x256xf32> -> vector<8x256xf32>
    %51 = vector.broadcast %4 : vector<1x256xf32> to vector<8x256xf32>
    %52 = arith.addf %50, %51 : vector<8x256xf32>
    %cst_25 = arith.constant 0.000000e+00 : f32
    %53 = vector.broadcast %cst_25 : f32 to vector<8x256xf32>
    %54 = arith.maximumf %52, %53 : vector<8x256xf32>
    %55 = arith.truncf %54 : vector<8x256xf32> to vector<8x256xbf16>
    %c0_26 = arith.constant 0 : index
    %c0_27 = arith.constant 0 : index
    %56 = vector.load %arg5[%c0_26, %c0_27] : memref<256x512xbf16, #tpu.memory_space<vmem>>, vector<256x512xbf16>
    %cst_28 = arith.constant dense<0.000000e+00> : vector<8x512xf32>
    %57 = tpu.matmul %55, %56, %cst_28 {dimension_numbers = #tpu.dot_dimension_numbers<[1], [0], [0], [1], [0, 0, 1, 1], [], []>} : vector<8x256xbf16>, vector<256x512xbf16>, vector<8x512xf32> -> vector<8x512xf32>
    %58 = vector.broadcast %5 : vector<1x512xf32> to vector<8x512xf32>
    %59 = arith.addf %57, %58 : vector<8x512xf32>
    %60 = arith.negf %59 : vector<8x512xf32>
    %61 = math.exp %60 : vector<8x512xf32>
    %cst_29 = arith.constant 1.000000e+00 : f32
    %62 = vector.broadcast %cst_29 : f32 to vector<8x512xf32>
    %63 = arith.addf %62, %61 : vector<8x512xf32>
    %64 = arith.divf %62, %63 : vector<8x512xf32>
    %c0_30 = arith.constant 0 : index
    %c0_31 = arith.constant 0 : index
    %65 = vector.load %arg7[%c0_30, %c0_31] : memref<8x512xf32, #tpu.memory_space<vmem>>, vector<8x512xf32>
    tpu.vector_store %arg7[%c0_30, %c0_31], %64 {strides = array<i32>} : memref<8x512xf32, #tpu.memory_space<vmem>>, vector<8x512xf32>,
    %c0_32 = arith.constant 0 : index
    %c0_33 = arith.constant 0 : index
    %66 = vector.load %arg8[%c0_32, %c0_33] : memref<8x768xf32, #tpu.memory_space<vmem>>, vector<8x256xf32>
    tpu.vector_store %arg8[%c0_32, %c0_33], %41 {strides = array<i32>} : memref<8x768xf32, #tpu.memory_space<vmem>>, vector<8x256xf32>,
    %c0_34 = arith.constant 0 : index
    %c256_35 = arith.constant 256 : index
    %67 = vector.load %arg8[%c0_34, %c256_35] : memref<8x768xf32, #tpu.memory_space<vmem>>, vector<8x256xf32>
    tpu.vector_store %arg8[%c0_34, %c256_35], %19 {strides = array<i32>} : memref<8x768xf32, #tpu.memory_space<vmem>>, vector<8x256xf32>,
    %c0_36 = arith.constant 0 : index
    %c512 = arith.constant 512 : index
    %68 = vector.load %arg8[%c0_36, %c512] : memref<8x768xf32, #tpu.memory_space<vmem>>, vector<8x256xf32>
    tpu.vector_store %arg8[%c0_36, %c512], %47 {strides = array<i32>} : memref<8x768xf32, #tpu.memory_space<vmem>>, vector<8x256xf32>,
    return
  }
}

</mosaic_0001>

<bundles_post_ra>
// kernel: tpu_custom_call.1
= control target key start
LH: loop header
LB: loop body
LE: loop exit
PB: predicated region body
PF: predicated region fallthrough
CT: control target
= control target key end

     0   :  { %14 = vsyncpa [#allocation3], 0  ;;  %s3706_s0 = inlined_call_operand.hbm [shape: bf16[8,512], index: 0, kind: input, shape index: {}]   ;;  %s3707_s1 = inlined_call_operand.hbm [shape: f32[8,256], index: 1, kind: input, shape index: {}]   ;;  %s3708_s2 = inlined_call_operand.hbm [shape: bf16[512,256], index: 2, kind: input, shape index: {}]   ;;  %s3709_s3 = inlined_call_operand.hbm [shape: bf16[256,512], index: 3, kind: input, shape index: {}]   ;;  %s3710_s4 = inlined_call_operand.hbm [shape: bf16[256,256], index: 4, kind: input, shape index: {}]   ;;  %s3711_s5 = inlined_call_operand.hbm [shape: bf16[256,512], index: 5, kind: input, shape index: {}]   ;;  %s3712_s6 = inlined_call_operand.hbm [shape: f32[1,2048], index: 6, kind: input, shape index: {}]   ;;  %s3713_s7 = inlined_call_operand.hbm [shape: f32[8,512], index: 7, kind: output, shape index: {0}]   ;;  %s3714_s8 = inlined_call_operand.hbm [shape: f32[8,768], index: 8, kind: output, shape index: {1}]  }
   0x1   :  { %15 = vsyncpa [#allocation6], 0 }
   0x2   :  { %16 = vsyncpa [#allocation9], 0 }
   0x3   :  { %17 = vsyncpa [#allocation12], 0 }
   0x4   :  { %18 = vsyncpa [#allocation4], 0  ;;  %s36_s29 = sshll.u32 %s3707_s1, 4  ;;  %s37_s29 = int_to_ptr.hbm [resolvable:$true] %s36_s29 }
   0x5   :  { %19 = vsyncpa [#allocation16], 0  ;;  %s3504_s30 = smov [#allocation5]   ;;  %s59_s12 = sshll.u32 %s3709_s3, 4  ;;  %s60_s12 = int_to_ptr.hbm [resolvable:$true] %s59_s12 }
   0x6   :  { %s38_s9 = sshll.u32 %s3504_s30, 4  ;;  %s3505_s13 = smov [#allocation8]   ;;  %s39_s9 = int_to_ptr.vmem [resolvable:$true] %s38_s9 }
   0x7   :  { %41 = dma.hbm_to_vmem [thread:$0]  %s37_s29, 256, %s39_s9, [#allocation6]  }
   0x8   :  { %s61_s14 = sshll.u32 %s3505_s13, 4  ;;  %s3506_s15 = smov 256   ;;  %s62_s14 = int_to_ptr.vmem [resolvable:$true] %s61_s14 }
   0x9   :  { %s3507_s16 = smov 16   ;;  %s85_s1 = sshll.u32 %s3711_s5, 4  ;;  %s86_s1 = int_to_ptr.hbm [resolvable:$true] %s85_s1 }
   0xa   :  { %67 = dma.hbm_to_vmem [thread:$0]  %s60_s12, 8192, %s62_s14, [#allocation9], %s3506_s15, %s3506_s15, %s3507_s16  }
   0xb   :  { %s3508_s19 = smov [#allocation11]   ;;  %s25_s3 = sshll.u32 %s3706_s0, 4  ;;  %s26_s3 = int_to_ptr.hbm [resolvable:$true] %s25_s3 }
   0xc   :  { %s87_s20 = sshll.u32 %s3508_s19, 4  ;;  %s3509_s23 = smov [#allocation2]   ;;  %s88_s20 = int_to_ptr.vmem [resolvable:$true] %s87_s20 }
   0xd   :  { %93 = dma.hbm_to_vmem [thread:$0]  %s86_s1, 8192, %s88_s20, [#allocation12], %s3506_s15, %s3506_s15, %s3507_s16  }
   0xe   :  { %s27_s24 = sshll.u32 %s3509_s23, 4  ;;  %s46_s27 = sshll.u32 %s3708_s2, 4  ;;  %s28_s24 = int_to_ptr.vmem [resolvable:$true] %s27_s24  ;;  %s47_s27 = int_to_ptr.hbm [resolvable:$true] %s46_s27 }
   0xf   :  { %30 = dma.hbm_to_vmem [thread:$0]  %s26_s3, 256, %s28_s24, [#allocation3]  }
  0x10   :  { %s3510_s5 = smov [#allocation7]   ;;  %s72_s9 = sshll.u32 %s3710_s4, 4  ;;  %s73_s9 = int_to_ptr.hbm [resolvable:$true] %s72_s9 }
  0x11   :  { %s48_s28 = sshll.u32 %s3510_s5, 4  ;;  %s3511_s10 = smov 128   ;;  %s49_s28 = int_to_ptr.vmem [resolvable:$true] %s48_s28 }
  0x12   :  { %s3512_s0 = smov 8   ;;  %s3513_s11 = smov [#allocation10]  }
  0x13   :  { %54 = dma.hbm_to_vmem [thread:$0]  %s47_s27, 8192, %s49_s28, [#allocation6], %s3511_s10, %s3511_s10, %s3512_s0  }
  0x14   :  { %s74_s12 = sshll.u32 %s3513_s11, 4  ;;  %s99_s2 = sshll.u32 %s3712_s6, 4  ;;  %s75_s12 = int_to_ptr.vmem [resolvable:$true] %s74_s12  ;;  %s100_s2 = int_to_ptr.hbm [resolvable:$true] %s99_s2 }
  0x15   :  { %80 = dma.hbm_to_vmem [thread:$0]  %s73_s9, 4096, %s75_s12, [#allocation9], %s3511_s10, %s3511_s10, %s3512_s0  }
  0x16   :  { %s3514_s15 = smov [#allocation13]  }
  0x17   :  { %s101_s16 = sshll.u32 %s3514_s15, 4  ;;  %s102_s16 = int_to_ptr.vmem [resolvable:$true] %s101_s16 }
  0x18   :  { %104 = dma.hbm_to_vmem [thread:$0]  %s100_s2, 256, %s102_s16, [#allocation12]  }
  0x19   :  { %3492 = dma.done.wait [#allocation3], 256  }
  0x1a   :  { %3493 = vsyncadd [#allocation3], 4294967040 }
  0x1b   :  { %3494 = dma.done.wait [#allocation6], 8448  }
  0x1c   :  { %3495 = vsyncadd [#allocation6], 4294958848 }
  0x1d   :  { %3496 = dma.done.wait [#allocation9], 12288  }
  0x1e   :  { %3497 = vsyncadd [#allocation9], 4294955008 }
  0x1f   :  { %3498 = dma.done.wait [#allocation12], 8448  }
  0x20   :  { %3499 = vsyncadd [#allocation12], 4294958848  ;;  %v2170_v0 = vld [vmem:[#allocation7 + $0x70] sm:$0xf]  ;;  %v3027_v1 = vld [vmem:[#allocation7 + $0x74] sm:$0xf0] }
  0x21   :  { %v2234_v2 = vld [vmem:[#allocation7 + $0xf0] sm:$0xf]  ;;  %v2171_v3 = vor.u32 %v3027_v1, %v2170_v0  ;;  %v3043_v4 = vld [vmem:[#allocation7 + $0xf4] sm:$0xf0]  ;;  %v2162_v11 = vld [vmem:[#allocation7 + $0x60] sm:$0xf] }
  0x22   :  { %v2298_v5 = vld [vmem:[#allocation7 + $0x170] sm:$0xf]  ;;  %v3059_v6 = vld [vmem:[#allocation7 + $0x174] sm:$0xf0]  ;;  %v2235_v7 = vor.u32 %v3043_v4, %v2234_v2  ;;  %v3025_v13 = vld [vmem:[#allocation7 + $0x64] sm:$0xf0] }
  0x23   :  { %v2299_v8 = vor.u32 %v3059_v6, %v2298_v5  ;;  %v2362_v9 = vld [vmem:[#allocation7 + $0x1f0] sm:$0xf]  ;;  %v3075_v10 = vld [vmem:[#allocation7 + $0x1f4] sm:$0xf0]  ;;  %544 = vmatpush.bf16.msra.mxu0 %v2171_v3  ;;  %v2226_v14 = vld [vmem:[#allocation7 + $0xe0] sm:$0xf]  ;;  %v2163_v16 = vor.u32 %v3025_v13, %v2162_v11 }
  0x24   :  { %v2363_v12 = vor.u32 %v3075_v10, %v2362_v9  ;;  %v3041_v15 = vld [vmem:[#allocation7 + $0xe4] sm:$0xf0]  ;;  %557 = vmatpush.bf16.msra.mxu1 %v2235_v7  ;;  %v2290_v18 = vld [vmem:[#allocation7 + $0x160] sm:$0xf]  ;;  %v2154_v23 = vld [vmem:[#allocation7 + $0x50] sm:$0xf] }
  0x25   :  { %570 = vmatpush.bf16.msra.mxu2 %v2299_v8  ;;  %v2227_v17 = vor.u32 %v3041_v15, %v2226_v14  ;;  %v3057_v19 = vld [vmem:[#allocation7 + $0x164] sm:$0xf0]  ;;  %v2354_v20 = vld [vmem:[#allocation7 + $0x1e0] sm:$0xf]  ;;  %v3023_v24 = vld [vmem:[#allocation7 + $0x54] sm:$0xf0] }
  0x26   :  { %583 = vmatpush.bf16.msra.mxu3 %v2363_v12  ;;  %v2291_v21 = vor.u32 %v3057_v19, %v2290_v18  ;;  %v3073_v22 = vld [vmem:[#allocation7 + $0x1e4] sm:$0xf0]  ;;  %v2218_v26 = vld [vmem:[#allocation7 + $0xd0] sm:$0xf]  ;;  %v3039_v27 = vld [vmem:[#allocation7 + $0xd4] sm:$0xf0]  ;;  %v2155_v29 = vor.u32 %v3023_v24, %v2154_v23 }
  0x27   :  { %v2355_v25 = vor.u32 %v3073_v22, %v2354_v20  ;;  %v2282_v28 = vld [vmem:[#allocation7 + $0x150] sm:$0xf]  ;;  %545 = vmatpush.bf16.msra.mxu0 %v2163_v16  ;;  %v3055_v30 = vld [vmem:[#allocation7 + $0x154] sm:$0xf0]  ;;  %v2219_v33 = vor.u32 %v3039_v27, %v2218_v26  ;;  %v2146_v35 = vld [vmem:[#allocation7 + $0x40] sm:$0xf] }
  0x28   :  { %v2346_v31 = vld [vmem:[#allocation7 + $0x1d0] sm:$0xf]  ;;  %v3071_v32 = vld [vmem:[#allocation7 + $0x1d4] sm:$0xf0]  ;;  %558 = vmatpush.bf16.msra.mxu1 %v2227_v17  ;;  %v2283_v34 = vor.u32 %v3055_v30, %v2282_v28  ;;  %v3021_v36 = vld [vmem:[#allocation7 + $0x44] sm:$0xf0] }
  0x29   :  { %571 = vmatpush.bf16.msra.mxu2 %v2291_v21  ;;  %v2210_v37 = vld [vmem:[#allocation7 + $0xc0] sm:$0xf]  ;;  %v2347_v38 = vor.u32 %v3071_v32, %v2346_v31  ;;  %v3037_v39 = vld [vmem:[#allocation7 + $0xc4] sm:$0xf0]  ;;  %v2147_v44 = vor.u32 %v3021_v36, %v2146_v35  ;;  %v2138_v47 = vld [vmem:[#allocation7 + $0x30] sm:$0xf] }
  0x2a   :  { %584 = vmatpush.bf16.msra.mxu3 %v2355_v25  ;;  %v2274_v40 = vld [vmem:[#allocation7 + $0x140] sm:$0xf]  ;;  %v3053_v41 = vld [vmem:[#allocation7 + $0x144] sm:$0xf0]  ;;  %v2211_v45 = vor.u32 %v3037_v39, %v2210_v37  ;;  %v3019_v48 = vld [vmem:[#allocation7 + $0x34] sm:$0xf0] }
  0x2b   :  { %v2338_v42 = vld [vmem:[#allocation7 + $0x1c0] sm:$0xf]  ;;  %v3069_v43 = vld [vmem:[#allocation7 + $0x1c4] sm:$0xf0]  ;;  %546 = vmatpush.bf16.msra.mxu0 %v2155_v29  ;;  %v2275_v46 = vor.u32 %v3053_v41, %v2274_v40  ;;  %v2202_v49 = vld [vmem:[#allocation7 + $0xb0] sm:$0xf]  ;;  %v2139_v56 = vor.u32 %v3019_v48, %v2138_v47 }
  0x2c   :  { %559 = vmatpush.bf16.msra.mxu1 %v2219_v33  ;;  %v2339_v50 = vor.u32 %v3069_v43, %v2338_v42  ;;  %v3035_v51 = vld [vmem:[#allocation7 + $0xb4] sm:$0xf0]  ;;  %v2266_v52 = vld [vmem:[#allocation7 + $0x130] sm:$0xf]  ;;  %v2130_v59 = vld [vmem:[#allocation7 + $0x20] sm:$0xf] }
  0x2d   :  { %572 = vmatpush.bf16.msra.mxu2 %v2283_v34  ;;  %v3051_v53 = vld [vmem:[#allocation7 + $0x134] sm:$0xf0]  ;;  %v2330_v54 = vld [vmem:[#allocation7 + $0x1b0] sm:$0xf]  ;;  %v2203_v57 = vor.u32 %v3035_v51, %v2202_v49  ;;  %v3017_v60 = vld [vmem:[#allocation7 + $0x24] sm:$0xf0] }
  0x2e   :  { %585 = vmatpush.bf16.msra.mxu3 %v2347_v38  ;;  %v3067_v55 = vld [vmem:[#allocation7 + $0x1b4] sm:$0xf0]  ;;  %v2267_v58 = vor.u32 %v3051_v53, %v2266_v52  ;;  %v2194_v61 = vld [vmem:[#allocation7 + $0xa0] sm:$0xf]  ;;  %v3033_v63 = vld [vmem:[#allocation7 + $0xa4] sm:$0xf0]  ;;  %v2131_v4 = vor.u32 %v3017_v60, %v2130_v59 }
  0x2f   :  { %547 = vmatpush.bf16.msra.mxu0 %v2147_v44  ;;  %v2331_v62 = vor.u32 %v3067_v55, %v2330_v54  ;;  %v2258_v0 = vld [vmem:[#allocation7 + $0x120] sm:$0xf]  ;;  %v3049_v1 = vld [vmem:[#allocation7 + $0x124] sm:$0xf0]  ;;  %v2195_v5 = vor.u32 %v3033_v63, %v2194_v61  ;;  %v2122_v7 = vld [vmem:[#allocation7 + $0x10] sm:$0xf] }
  0x30   :  { %560 = vmatpush.bf16.msra.mxu1 %v2211_v45  ;;  %v2322_v2 = vld [vmem:[#allocation7 + $0x1a0] sm:$0xf]  ;;  %v3065_v3 = vld [vmem:[#allocation7 + $0x1a4] sm:$0xf0]  ;;  %v2259_v6 = vor.u32 %v3049_v1, %v2258_v0  ;;  %v3015_v8 = vld [vmem:[#allocation7 + $0x14] sm:$0xf0] }
  0x31   :  { %573 = vmatpush.bf16.msra.mxu2 %v2275_v46  ;;  %v2186_v9 = vld [vmem:[#allocation7 + $0x90] sm:$0xf]  ;;  %v2323_v10 = vor.u32 %v3065_v3, %v2322_v2  ;;  %v3031_v11 = vld [vmem:[#allocation7 + $0x94] sm:$0xf0]  ;;  %v2114_v16 = vld [vmem:[#allocation7] sm:$0xf]  ;;  %v2123_v17 = vor.u32 %v3015_v8, %v2122_v7 }
  0x32   :  { %586 = vmatpush.bf16.msra.mxu3 %v2339_v50  ;;  %v2250_v12 = vld [vmem:[#allocation7 + $0x110] sm:$0xf]  ;;  %v3047_v13 = vld [vmem:[#allocation7 + $0x114] sm:$0xf0]  ;;  %v3013_v18 = vld [vmem:[#allocation7 + $0x4] sm:$0xf0]  ;;  %v2187_v21 = vor.u32 %v3031_v11, %v2186_v9 }
  0x33   :  { %548 = vmatpush.bf16.msra.mxu0 %v2139_v56  ;;  %v2314_v14 = vld [vmem:[#allocation7 + $0x190] sm:$0xf]  ;;  %v3063_v15 = vld [vmem:[#allocation7 + $0x194] sm:$0xf0]  ;;  %v2178_v19 = vld [vmem:[#allocation7 + $0x80] sm:$0xf]  ;;  %v2251_v22 = vor.u32 %v3047_v13, %v2250_v12  ;;  %v2115_v33 = vor.u32 %v3013_v18, %v2114_v16 }
  0x34   :  { %561 = vmatpush.bf16.msra.mxu1 %v2203_v57  ;;  %v3029_v20 = vld [vmem:[#allocation7 + $0x84] sm:$0xf0]  ;;  %v2242_v23 = vld [vmem:[#allocation7 + $0x100] sm:$0xf]  ;;  %v2315_v26 = vor.u32 %v3063_v15, %v2314_v14  ;;  %v3026_v30 = vld [vmem:[#allocation7 + $0x74] sm:$0xf] }
  0x35   :  { %574 = vmatpush.bf16.msra.mxu2 %v2267_v58  ;;  %v3045_v24 = vld [vmem:[#allocation7 + $0x104] sm:$0xf0]  ;;  %v2306_v27 = vld [vmem:[#allocation7 + $0x180] sm:$0xf]  ;;  %v2172_v31 = vld [vmem:[#allocation7 + $0x78] sm:$0xf0]  ;;  %v2179_v38 = vor.u32 %v3029_v20, %v2178_v19 }
  0x36   :  { %587 = vmatpush.bf16.msra.mxu3 %v2331_v62  ;;  %v140_v25 = vld [vmem:[#allocation2 + $0x8] sm:$0xff]  ;;  %v139_v29 = vld [vmem:[#allocation2] sm:$0xff]  ;;  %v3042_v32 = vld [vmem:[#allocation7 + $0xf4] sm:$0xf]  ;;  %v2243_v39 = vor.u32 %v3045_v24, %v2242_v23  ;;  %v2175_v45 = vor.u32 %v3026_v30, %v2172_v31  ;;  %s3516_s4 = smov [#allocation15]   ;;  %s2094_s1 = sshll.u32 %s3714_s8, 4  ;;  %s2095_s1 = int_to_ptr.hbm [resolvable:$true] %s2094_s1 }
  0x37   :  { %549 = vmatpush.bf16.msra.mxu0 %v2131_v4  ;;  %v3061_v28 = vld [vmem:[#allocation7 + $0x184] sm:$0xf0]  ;;  %v2236_v34 = vld [vmem:[#allocation7 + $0xf8] sm:$0xf0]  ;;  %v3058_v35 = vld [vmem:[#allocation7 + $0x174] sm:$0xf]  ;;  %v214_v37 = vunpack.c.l.b16 %v140_v25  ;;  %v212_v42 = vunpack.c.l.b16 %v139_v29  ;;  %v215_v43 = vunpack.c.h.b16 %v140_v25  ;;  %v213_v46 = vunpack.c.h.b16 %v139_v29 }
  0x38   :  { %562 = vmatpush.bf16.msra.mxu1 %v2195_v5  ;;  %v2300_v36 = vld [vmem:[#allocation7 + $0x178] sm:$0xf0]  ;;  %v3074_v40 = vld [vmem:[#allocation7 + $0x1f4] sm:$0xf]  ;;  %v2307_v44 = vor.u32 %v3061_v28, %v2306_v27  ;;  %v2239_v47 = vor.u32 %v3042_v32, %v2236_v34  ;;  %v3024_v49 = vld [vmem:[#allocation7 + $0x64] sm:$0xf] }
  0x39   :  { %575 = vmatpush.bf16.msra.mxu2 %v2259_v6  ;;  %v2364_v41 = vld [vmem:[#allocation7 + $0x1f8] sm:$0xf0]  ;;  %v2303_v48 = vor.u32 %v3058_v35, %v2300_v36  ;;  %v2164_v50 = vld [vmem:[#allocation7 + $0x68] sm:$0xf0]  ;;  %v3040_v51 = vld [vmem:[#allocation7 + $0xe4] sm:$0xf]  ;;  %v3584_v53 = vpack.c.b16 %v214_v37, %v214_v37  ;;  %v3586_v57 = vpack.c.b16 %v212_v42, %v212_v42  ;;  %v3588_v58 = vpack.c.b16 %v215_v43, %v215_v43 }
  0x3a   :  { %588 = vmatpush.bf16.msra.mxu3 %v2323_v10  ;;  %v2367_v52 = vor.u32 %v3074_v40, %v2364_v41  ;;  %v2228_v54 = vld [vmem:[#allocation7 + $0xe8] sm:$0xf0]  ;;  %v3056_v55 = vld [vmem:[#allocation7 + $0x164] sm:$0xf]  ;;  %v2167_v61 = vor.u32 %v3024_v49, %v2164_v50  ;;  %v3590_v62 = vpack.c.b16 %v213_v46, %v213_v46  ;;  %v3022_v1 = vld [vmem:[#allocation7 + $0x54] sm:$0xf] }
  0x3b   :  { %550 = vmatpush.bf16.msra.mxu0 %v2123_v17  ;;  %v2292_v56 = vld [vmem:[#allocation7 + $0x168] sm:$0xf0]  ;;  %v3072_v59 = vld [vmem:[#allocation7 + $0x1e4] sm:$0xf]  ;;  %v2231_v63 = vor.u32 %v3040_v51, %v2228_v54  ;;  %v2156_v2 = vld [vmem:[#allocation7 + $0x58] sm:$0xf0] }
  0x3c   :  { %563 = vmatpush.bf16.msra.mxu1 %v2187_v21  ;;  %v2356_v60 = vld [vmem:[#allocation7 + $0x1e8] sm:$0xf0]  ;;  %v2295_v0 = vor.u32 %v3056_v55, %v2292_v56  ;;  %v3038_v3 = vld [vmem:[#allocation7 + $0xd4] sm:$0xf]  ;;  %v2220_v5 = vld [vmem:[#allocation7 + $0xd8] sm:$0xf0]  ;;  %v2159_v10 = vor.u32 %v3022_v1, %v2156_v2 }
  0x3d   :  { %576 = vmatpush.bf16.msra.mxu2 %v2251_v22  ;;  %v2359_v4 = vor.u32 %v3072_v59, %v2356_v60  ;;  %v3054_v6 = vld [vmem:[#allocation7 + $0x154] sm:$0xf]  ;;  %v2284_v7 = vld [vmem:[#allocation7 + $0x158] sm:$0xf0]  ;;  %v2223_v11 = vor.u32 %v3038_v3, %v2220_v5  ;;  %v3020_v13 = vld [vmem:[#allocation7 + $0x44] sm:$0xf] }
  0x3e   :  { %589 = vmatpush.bf16.msra.mxu3 %v2315_v26  ;;  %v3070_v8 = vld [vmem:[#allocation7 + $0x1d4] sm:$0xf]  ;;  %v2348_v9 = vld [vmem:[#allocation7 + $0x1d8] sm:$0xf0]  ;;  %v2287_v12 = vor.u32 %v3054_v6, %v2284_v7  ;;  %v2148_v14 = vld [vmem:[#allocation7 + $0x48] sm:$0xf0] }
  0x3f   :  { %551 = vmatpush.bf16.msra.mxu0 %v2115_v33  ;;  %v3036_v15 = vld [vmem:[#allocation7 + $0xc4] sm:$0xf]  ;;  %v2351_v16 = vor.u32 %v3070_v8, %v2348_v9  ;;  %v2212_v17 = vld [vmem:[#allocation7 + $0xc8] sm:$0xf0]  ;;  %v2151_v22 = vor.u32 %v3020_v13, %v2148_v14  ;;  %v3018_v25 = vld [vmem:[#allocation7 + $0x34] sm:$0xf] }
  0x40   :  { %564 = vmatpush.bf16.msra.mxu1 %v2179_v38  ;;  %v3052_v18 = vld [vmem:[#allocation7 + $0x144] sm:$0xf]  ;;  %v2276_v19 = vld [vmem:[#allocation7 + $0x148] sm:$0xf0]  ;;  %v2215_v23 = vor.u32 %v3036_v15, %v2212_v17  ;;  %v2140_v26 = vld [vmem:[#allocation7 + $0x38] sm:$0xf0] }
  0x41   :  { %577 = vmatpush.bf16.msra.mxu2 %v2243_v39  ;;  %v3068_v20 = vld [vmem:[#allocation7 + $0x1c4] sm:$0xf]  ;;  %v2340_v21 = vld [vmem:[#allocation7 + $0x1c8] sm:$0xf0]  ;;  %v2279_v24 = vor.u32 %v3052_v18, %v2276_v19  ;;  %v3034_v27 = vld [vmem:[#allocation7 + $0xb4] sm:$0xf]  ;;  %v2143_v34 = vor.u32 %v3018_v25, %v2140_v26 }
  0x42   :  { %590 = vmatpush.bf16.msra.mxu3 %v2307_v44  ;;  %552 = vmatmul.bf16.vlgmr.msra.gmra.mxu0 %v3586_v57  ;;  %v2343_v28 = vor.u32 %v3068_v20, %v2340_v21  ;;  %v2204_v29 = vld [vmem:[#allocation7 + $0xb8] sm:$0xf0]  ;;  %v3050_v30 = vld [vmem:[#allocation7 + $0x134] sm:$0xf]  ;;  %v3016_v37 = vld [vmem:[#allocation7 + $0x24] sm:$0xf] }
  0x43   :  { %596 = vmatpush.bf16.msrb.mxu0 %v2175_v45  ;;  %565 = vmatmul.bf16.vlgmr.msra.gmra.mxu1 %v3590_v62  ;;  %v2268_v31 = vld [vmem:[#allocation7 + $0x138] sm:$0xf0]  ;;  %v3066_v32 = vld [vmem:[#allocation7 + $0x1b4] sm:$0xf]  ;;  %v2207_v35 = vor.u32 %v3034_v27, %v2204_v29  ;;  %v2132_v38 = vld [vmem:[#allocation7 + $0x28] sm:$0xf0] }
  0x44   :  { %609 = vmatpush.bf16.msrb.mxu1 %v2239_v47  ;;  %578 = vmatmul.bf16.vlgmr.msra.gmra.mxu2 %v3584_v53  ;;  %v2332_v33 = vld [vmem:[#allocation7 + $0x1b8] sm:$0xf0]  ;;  %v2271_v36 = vor.u32 %v3050_v30, %v2268_v31  ;;  %v3032_v39 = vld [vmem:[#allocation7 + $0xa4] sm:$0xf]  ;;  %v2196_v41 = vld [vmem:[#allocation7 + $0xa8] sm:$0xf0]  ;;  %v2135_v46 = vor.u32 %v3016_v37, %v2132_v38 }
  0x45   :  { %622 = vmatpush.bf16.msrb.mxu2 %v2303_v48  ;;  %591 = vmatmul.bf16.vlgmr.msra.gmra.mxu3 %v3588_v58  ;;  %v2335_v40 = vor.u32 %v3066_v32, %v2332_v33  ;;  %v3048_v42 = vld [vmem:[#allocation7 + $0x124] sm:$0xf]  ;;  %v2260_v43 = vld [vmem:[#allocation7 + $0x128] sm:$0xf0]  ;;  %v2199_v47 = vor.u32 %v3032_v39, %v2196_v41  ;;  %v3014_v49 = vld [vmem:[#allocation7 + $0x14] sm:$0xf] }
  0x46   :  { %635 = vmatpush.bf16.msrb.mxu3 %v2367_v52  ;;  %v3064_v44 = vld [vmem:[#allocation7 + $0x1a4] sm:$0xf]  ;;  %v2324_v45 = vld [vmem:[#allocation7 + $0x1a8] sm:$0xf0]  ;;  %v2263_v48 = vor.u32 %v3048_v42, %v2260_v43  ;;  %v2124_v50 = vld [vmem:[#allocation7 + $0x18] sm:$0xf0] }
  0x47   :  { %597 = vmatpush.bf16.msrb.mxu0 %v2167_v61  ;;  %v3030_v51 = vld [vmem:[#allocation7 + $0x94] sm:$0xf]  ;;  %v2327_v52 = vor.u32 %v3064_v44, %v2324_v45  ;;  %v2188_v54 = vld [vmem:[#allocation7 + $0x98] sm:$0xf0]  ;;  %v2127_v61 = vor.u32 %v3014_v49, %v2124_v50  ;;  %v2116_v2 = vld [vmem:[#allocation7 + $0x8] sm:$0xf0] }
  0x48   :  { %610 = vmatpush.bf16.msrb.mxu1 %v2231_v63  ;;  %v3046_v55 = vld [vmem:[#allocation7 + $0x114] sm:$0xf]  ;;  %v2252_v56 = vld [vmem:[#allocation7 + $0x118] sm:$0xf0]  ;;  %v3012_v63 = vld [vmem:[#allocation7 + $0x4] sm:$0xf] }
  0x49   :  { %623 = vmatpush.bf16.msrb.mxu2 %v2295_v0  ;;  %v3062_v59 = vld [vmem:[#allocation7 + $0x194] sm:$0xf]  ;;  %v2316_v60 = vld [vmem:[#allocation7 + $0x198] sm:$0xf0]  ;;  %v2191_v0 = vor.u32 %v3030_v51, %v2188_v54  ;;  %v2255_v1 = vor.u32 %v3046_v55, %v2252_v56  ;;  %v3028_v3 = vld [vmem:[#allocation7 + $0x84] sm:$0xf] }
  0x4a   :  { %636 = vmatpush.bf16.msrb.mxu3 %v2359_v4  ;;  %v2180_v4 = vld [vmem:[#allocation7 + $0x88] sm:$0xf0]  ;;  %v2319_v5 = vor.u32 %v3062_v59, %v2316_v60  ;;  %v3044_v6 = vld [vmem:[#allocation7 + $0x104] sm:$0xf]  ;;  %v2484_v14 = vld [vmem:[#allocation8 + $0xf0] sm:$0xf0] }
  0x4b   :  { %598 = vmatpush.bf16.msrb.mxu0 %v2159_v10  ;;  %v2244_v7 = vld [vmem:[#allocation7 + $0x108] sm:$0xf0]  ;;  %v3060_v8 = vld [vmem:[#allocation7 + $0x184] sm:$0xf]  ;;  %v2482_v10 = vld [vmem:[#allocation8 + $0xe0] sm:$0xf]  ;;  %v2183_v15 = vor.u32 %v3028_v3, %v2180_v4 }
  0x4c   :  { %611 = vmatpush.bf16.msrb.mxu1 %v2223_v11  ;;  %v2308_v9 = vld [vmem:[#allocation7 + $0x188] sm:$0xf0]  ;;  %v3106_v11 = vld [vmem:[#allocation8 + $0xec] sm:$0xf0]  ;;  %v3104_v13 = vld [vmem:[#allocation8 + $0xe4] sm:$0xf] }
  0x4d   :  { %624 = vmatpush.bf16.msrb.mxu2 %v2287_v12  ;;  %v2119_v12 = vor.u32 %v3012_v63, %v2116_v2  ;;  %v2311_v17 = vor.u32 %v3060_v8, %v2308_v9  ;;  %v2483_v18 = vor.u32 %v3106_v11, %v2482_v10  ;;  %v2466_v19 = vld [vmem:[#allocation8 + $0xc0] sm:$0xf]  ;;  %v3102_v20 = vld [vmem:[#allocation8 + $0xcc] sm:$0xf0]  ;;  %v2487_v21 = vor.u32 %v3104_v13, %v2484_v14  ;;  %v3100_v25 = vld [vmem:[#allocation8 + $0xc4] sm:$0xf] }
  0x4e   :  { %637 = vmatpush.bf16.msrb.mxu3 %v2351_v16  ;;  %v2247_v16 = vor.u32 %v3044_v6, %v2244_v7  ;;  %v2468_v26 = vld [vmem:[#allocation8 + $0xd0] sm:$0xf0]  ;;  %v2467_v29 = vor.u32 %v3102_v20, %v2466_v19  ;;  %v2450_v32 = vld [vmem:[#allocation8 + $0xa0] sm:$0xf]  ;;  %v3098_v33 = vld [vmem:[#allocation8 + $0xac] sm:$0xf0] }
  0x4f   :  { %599 = vmatpush.bf16.msrb.mxu0 %v2151_v22  ;;  %v2610_v22 = vld [vmem:[#allocation8 + $0x1e0] sm:$0xf]  ;;  %v2612_v27 = vld [vmem:[#allocation8 + $0x1f0] sm:$0xf0]  ;;  %v2471_v31 = vor.u32 %v3100_v25, %v2468_v26  ;;  %v3092_v39 = vld [vmem:[#allocation8 + $0x84] sm:$0xf] }
  0x50   :  { %612 = vmatpush.bf16.msrb.mxu1 %v2215_v23  ;;  %v3138_v23 = vld [vmem:[#allocation8 + $0x1ec] sm:$0xf0]  ;;  %v2434_v38 = vld [vmem:[#allocation8 + $0x80] sm:$0xf]  ;;  %v3088_v43 = vld [vmem:[#allocation8 + $0x64] sm:$0xf] }
  0x51   :  { %625 = vmatpush.bf16.msrb.mxu2 %v2279_v24  ;;  %v3136_v24 = vld [vmem:[#allocation8 + $0x1e4] sm:$0xf]  ;;  %v2418_v42 = vld [vmem:[#allocation8 + $0x60] sm:$0xf]  ;;  %v2420_v44 = vld [vmem:[#allocation8 + $0x70] sm:$0xf0] }
  0x52   :  { %638 = vmatpush.bf16.msrb.mxu3 %v2343_v28  ;;  %v2611_v28 = vor.u32 %v3138_v23, %v2610_v22  ;;  %v2615_v30 = vor.u32 %v3136_v24, %v2612_v27  ;;  %v2423_v45 = vor.u32 %v3088_v43, %v2420_v44  ;;  %v2404_v49 = vld [vmem:[#allocation8 + $0x50] sm:$0xf0]  ;;  %v3082_v54 = vld [vmem:[#allocation8 + $0x2c] sm:$0xf0]  ;;  %v3080_v55 = vld [vmem:[#allocation8 + $0x24] sm:$0xf] }
  0x53   :  { %600 = vmatpush.bf16.msrb.mxu0 %v2143_v34  ;;  %v3096_v34 = vld [vmem:[#allocation8 + $0xa4] sm:$0xf]  ;;  %v2388_v56 = vld [vmem:[#allocation8 + $0x30] sm:$0xf0]  ;;  %v3078_v63 = vld [vmem:[#allocation8 + $0xc] sm:$0xf0] }
  0x54   :  { %613 = vmatpush.bf16.msrb.mxu1 %v2207_v35  ;;  %v2452_v35 = vld [vmem:[#allocation8 + $0xb0] sm:$0xf0]  ;;  %v2391_v60 = vor.u32 %v3080_v55, %v2388_v56  ;;  %v2490_v2 = vld [vmem:[#allocation8 + $0xe8] sm:$0xf]  ;;  %v3107_v3 = vld [vmem:[#allocation8 + $0xf4] sm:$0xf0] }
  0x55   :  { %626 = vmatpush.bf16.msrb.mxu2 %v2271_v36  ;;  %v2451_v36 = vor.u32 %v3098_v33, %v2450_v32  ;;  %v2455_v37 = vor.u32 %v3096_v34, %v2452_v35  ;;  %v3105_v4 = vld [vmem:[#allocation8 + $0xec] sm:$0xf]  ;;  %v2491_v8 = vor.u32 %v3107_v3, %v2490_v2  ;;  %v2594_v10 = vld [vmem:[#allocation8 + $0x1c0] sm:$0xf]  ;;  %v3134_v11 = vld [vmem:[#allocation8 + $0x1cc] sm:$0xf0] }
  0x56   :  { %639 = vmatpush.bf16.msrb.mxu3 %v2335_v40  ;;  %v2436_v40 = vld [vmem:[#allocation8 + $0x90] sm:$0xf0]  ;;  %v2595_v13 = vor.u32 %v3134_v11, %v2594_v10  ;;  %v3101_v19 = vld [vmem:[#allocation8 + $0xcc] sm:$0xf]  ;;  %v2476_v20 = vld [vmem:[#allocation8 + $0xd8] sm:$0xf0] }
  0x57   :  { %601 = vmatpush.bf16.msrb.mxu0 %v2135_v46  ;;  %v2402_v46 = vld [vmem:[#allocation8 + $0x40] sm:$0xf]  ;;  %v2596_v14 = vld [vmem:[#allocation8 + $0x1d0] sm:$0xf0]  ;;  %v3130_v23 = vld [vmem:[#allocation8 + $0x1ac] sm:$0xf0] }
  0x58   :  { %614 = vmatpush.bf16.msrb.mxu1 %v2199_v47  ;;  %v3086_v47 = vld [vmem:[#allocation8 + $0x4c] sm:$0xf0]  ;;  %v2578_v22 = vld [vmem:[#allocation8 + $0x1a0] sm:$0xf]  ;;  %v3128_v24 = vld [vmem:[#allocation8 + $0x1a4] sm:$0xf] }
  0x59   :  { %627 = vmatpush.bf16.msrb.mxu2 %v2263_v48  ;;  %v3084_v48 = vld [vmem:[#allocation8 + $0x44] sm:$0xf]  ;;  %v2403_v50 = vor.u32 %v3086_v47, %v2402_v46  ;;  %v2579_v25 = vor.u32 %v3130_v23, %v2578_v22  ;;  %v2580_v26 = vld [vmem:[#allocation8 + $0x1b0] sm:$0xf0]  ;;  %v2458_v27 = vld [vmem:[#allocation8 + $0xa8] sm:$0xf] }
  0x5a   :  { %640 = vmatpush.bf16.msrb.mxu3 %v2327_v52  ;;  %v2407_v51 = vor.u32 %v3084_v48, %v2404_v49  ;;  %v2386_v52 = vld [vmem:[#allocation8 + $0x20] sm:$0xf]  ;;  %v2460_v32 = vld [vmem:[#allocation8 + $0xb8] sm:$0xf0]  ;;  %v3126_v35 = vld [vmem:[#allocation8 + $0x18c] sm:$0xf0] }
  0x5b   :  { %602 = vmatpush.bf16.msrb.mxu0 %v2127_v61  ;;  %v2387_v59 = vor.u32 %v3082_v54, %v2386_v52  ;;  %v2370_v61 = vld [vmem:[#allocation8] sm:$0xf]  ;;  %v3122_v44 = vld [vmem:[#allocation8 + $0x16c] sm:$0xf0]  ;;  %v2548_v46 = vld [vmem:[#allocation8 + $0x170] sm:$0xf0] }
  0x5c   :  { %615 = vmatpush.bf16.msrb.mxu1 %v2191_v0  ;;  %v3076_v0 = vld [vmem:[#allocation8 + $0x4] sm:$0xf]  ;;  %v2371_v6 = vor.u32 %v3078_v63, %v2370_v61  ;;  %v2562_v34 = vld [vmem:[#allocation8 + $0x180] sm:$0xf]  ;;  %v2426_v47 = vld [vmem:[#allocation8 + $0x68] sm:$0xf] }
  0x5d   :  { %628 = vmatpush.bf16.msrb.mxu2 %v2255_v1  ;;  %v2372_v1 = vld [vmem:[#allocation8 + $0x10] sm:$0xf0]  ;;  %v2546_v43 = vld [vmem:[#allocation8 + $0x160] sm:$0xf]  ;;  %v3091_v48 = vld [vmem:[#allocation8 + $0x74] sm:$0xf0] }
  0x5e   :  { %641 = vmatpush.bf16.msrb.mxu3 %v2319_v5  ;;  %v2492_v5 = vld [vmem:[#allocation8 + $0xf8] sm:$0xf0]  ;;  %v2375_v7 = vor.u32 %v3076_v0, %v2372_v1  ;;  %v2530_v54 = vld [vmem:[#allocation8 + $0x140] sm:$0xf]  ;;  %v3118_v56 = vld [vmem:[#allocation8 + $0x14c] sm:$0xf0] }
  0x5f   :  { %603 = vmatpush.bf16.msrb.mxu0 %v2119_v12  ;;  %v2495_v9 = vor.u32 %v3105_v4, %v2492_v5  ;;  %v3132_v12 = vld [vmem:[#allocation8 + $0x1c4] sm:$0xf]  ;;  %v2428_v52 = vld [vmem:[#allocation8 + $0x78] sm:$0xf0]  ;;  %v2531_v61 = vor.u32 %v3118_v56, %v2530_v54  ;;  %v2410_v0 = vld [vmem:[#allocation8 + $0x48] sm:$0xf] }
  0x60   :  { %616 = vmatpush.bf16.msrb.mxu1 %v2183_v15  ;;  %v2474_v15 = vld [vmem:[#allocation8 + $0xc8] sm:$0xf]  ;;  %v3087_v1 = vld [vmem:[#allocation8 + $0x54] sm:$0xf0]  ;;  %v3085_v2 = vld [vmem:[#allocation8 + $0x4c] sm:$0xf] }
  0x61   :  { %629 = vmatpush.bf16.msrb.mxu2 %v2247_v16  ;;  %v3103_v16 = vld [vmem:[#allocation8 + $0xd4] sm:$0xf0]  ;;  %v2411_v3 = vor.u32 %v3087_v1, %v2410_v0  ;;  %v2412_v4 = vld [vmem:[#allocation8 + $0x58] sm:$0xf0]  ;;  %v2514_v5 = vld [vmem:[#allocation8 + $0x120] sm:$0xf] }
  0x62   :  { %642 = vmatpush.bf16.msrb.mxu3 %v2311_v17  ;;  %604 = vmatmul.bf16.vlgmr.msrb.gmra.mxu0 %v3586_v57  ;;  %v3094_v57 = vld [vmem:[#allocation8 + $0x8c] sm:$0xf0]  ;;  %v2599_v17 = vor.u32 %v3132_v12, %v2596_v14  ;;  %v2394_v10 = vld [vmem:[#allocation8 + $0x28] sm:$0xf]  ;;  %v3083_v12 = vld [vmem:[#allocation8 + $0x34] sm:$0xf0] }
  0x63   :  { %1045 = vmatpush.bf16.msra.mxu0 %v2483_v18  ;;  %617 = vmatmul.bf16.vlgmr.msrb.gmra.mxu1 %v3590_v62  ;;  %v2435_v41 = vor.u32 %v3094_v57, %v2434_v38  ;;  %v2439_v62 = vor.u32 %v3092_v39, %v2436_v40  ;;  %v2475_v18 = vor.u32 %v3103_v16, %v2474_v15  ;;  %v2564_v38 = vld [vmem:[#allocation8 + $0x190] sm:$0xf0]  ;;  %v2442_v57 = vld [vmem:[#allocation8 + $0x88] sm:$0xf]  ;;  %v3095_v39 = vld [vmem:[#allocation8 + $0x94] sm:$0xf0] }
  0x64   :  { %630 = vmatmul.bf16.vlgmr.msrb.gmra.mxu2 %v3584_v53  ;;  %1058 = vmatpush.bf16.msra.mxu1 %v2611_v28  ;;  %v3090_v53 = vld [vmem:[#allocation8 + $0x6c] sm:$0xf0]  ;;  %v3099_v28 = vld [vmem:[#allocation8 + $0xb4] sm:$0xf0]  ;;  %v2396_v14 = vld [vmem:[#allocation8 + $0x38] sm:$0xf0]  ;;  %v2395_v16 = vor.u32 %v3083_v12, %v2394_v10 }
  0x65   :  { %1071 = vmatpush.bf16.msra.mxu2 %v2487_v21  ;;  %643 = vmatmul.bf16.vlgmr.msrb.gmra.mxu3 %v3588_v58  ;;  %v2419_v58 = vor.u32 %v3090_v53, %v2418_v42  ;;  %v2479_v21 = vor.u32 %v3101_v19, %v2476_v20  ;;  %v2444_v42 = vld [vmem:[#allocation8 + $0x98] sm:$0xf0]  ;;  %v3108_v19 = vld [vmem:[#allocation8 + $0x104] sm:$0xf]  ;;  %v2378_v22 = vld [vmem:[#allocation8 + $0x8] sm:$0xf] }
  0x66   :  { %1084 = vmatpush.bf16.msra.mxu3 %v2615_v30  ;;  %v2459_v30 = vor.u32 %v3099_v28, %v2458_v27  ;;  %v3079_v23 = vld [vmem:[#allocation8 + $0x14] sm:$0xf0]  ;;  %v3600_v27 = vld [vmem:[#allocation13] sm:$0x3]  ;;  %v2570_v54 = vld [vmem:[#allocation8 + $0x188] sm:$0xf] }
  0x67   :  { %1046 = vmatpush.bf16.msra.mxu0 %v2467_v29  ;;  %v2583_v29 = vor.u32 %v3128_v24, %v2580_v26  ;;  %v3077_v24 = vld [vmem:[#allocation8 + $0xc] sm:$0xf]  ;;  %v3119_v10 = vld [vmem:[#allocation8 + $0x154] sm:$0xf0]  ;;  %s2092_s6 = sshll.u32 %s3516_s4, 4  ;;  %s3517_s8 = smov [#allocation14]   ;;  %s2093_s6 = int_to_ptr.vmem [resolvable:$true] %s2092_s6 }
  0x68   :  { %1059 = vmatpush.bf16.msra.mxu1 %v2595_v13  ;;  %v3081_v13 = vld [vmem:[#allocation8 + $0x2c] sm:$0xf]  ;;  %s2081_s19 = sshll.u32 %s3517_s8, 4  ;;  %s2083_s22 = sshll.u32 %s3713_s7, 4  ;;  %s2082_s19 = int_to_ptr.vmem [resolvable:$true] %s2081_s19  ;;  %s2084_s22 = int_to_ptr.hbm [resolvable:$true] %s2083_s22 }
  0x69   :  { %1072 = vmatpush.bf16.msra.mxu2 %v2471_v31  ;;  %v3097_v31 = vld [vmem:[#allocation8 + $0xac] sm:$0xf]  ;;  %v2399_v20 = vor.u32 %v3081_v13, %v2396_v14  ;;  %v2540_v14 = vld [vmem:[#allocation8 + $0x158] sm:$0xf0] }
  0x6a   :  { %1085 = vmatpush.bf16.msra.mxu3 %v2599_v17  ;;  %v2463_v33 = vor.u32 %v3097_v31, %v2460_v32  ;;  %v2498_v17 = vld [vmem:[#allocation8 + $0x100] sm:$0xf]  ;;  %v2618_v31 = vld [vmem:[#allocation8 + $0x1e8] sm:$0xf]  ;;  %v3139_v32 = vld [vmem:[#allocation8 + $0x1f4] sm:$0xf0] }
  0x6b   :  { %1047 = vmatpush.bf16.msra.mxu0 %v2451_v36  ;;  %v3124_v36 = vld [vmem:[#allocation8 + $0x184] sm:$0xf]  ;;  %v3125_v56 = vld [vmem:[#allocation8 + $0x18c] sm:$0xf] }
  0x6c   :  { %1060 = vmatpush.bf16.msra.mxu1 %v2579_v25  ;;  %v2567_v40 = vor.u32 %v3124_v36, %v2564_v38  ;;  %v2380_v25 = vld [vmem:[#allocation8 + $0x18] sm:$0xf0]  ;;  %v206_v36 = vperm.slane %v3600_v27, 0  ;;  %v2602_v38 = vld [vmem:[#allocation8 + $0x1c8] sm:$0xf] }
  0x6d   :  { %1073 = vmatpush.bf16.msra.mxu2 %v2455_v37  ;;  %v2563_v37 = vor.u32 %v3126_v35, %v2562_v34  ;;  %v2619_v34 = vor.u32 %v3139_v32, %v2618_v31  ;;  %v2620_v35 = vld [vmem:[#allocation8 + $0x1f8] sm:$0xf0]  ;;  %v3117_v13 = vld [vmem:[#allocation8 + $0x14c] sm:$0xf]  ;;  %v207_v31 = vperm.slane %v3600_v27, 1 }
  0x6e   :  { %1086 = vmatpush.bf16.msra.mxu3 %v2583_v29  ;;  %v2379_v29 = vor.u32 %v3079_v23, %v2378_v22 }
  0x6f   :  { %1048 = vmatpush.bf16.msra.mxu0 %v2435_v41  ;;  %v2443_v41 = vor.u32 %v3095_v39, %v2442_v57  ;;  %v3135_v57 = vld [vmem:[#allocation8 + $0x1d4] sm:$0xf0]  ;;  %v3133_v39 = vld [vmem:[#allocation8 + $0x1cc] sm:$0xf] }
  0x70   :  { %1061 = vmatpush.bf16.msra.mxu1 %v2563_v37 }
  0x71   :  { %1074 = vmatpush.bf16.msra.mxu2 %v2439_v62  ;;  %v3093_v62 = vld [vmem:[#allocation8 + $0x8c] sm:$0xf] }
  0x72   :  { %v2447_v53 = vor.u32 %v3093_v62, %v2444_v42  ;;  %1087 = vmatpush.bf16.msra.mxu3 %v2567_v40  ;;  %v2604_v62 = vld [vmem:[#allocation8 + $0x1d8] sm:$0xf0] }
  0x73   :  { %1049 = vmatpush.bf16.msra.mxu0 %v2419_v58  ;;  %v3120_v58 = vld [vmem:[#allocation8 + $0x164] sm:$0xf] }
  0x74   :  { %v2551_v49 = vor.u32 %v3120_v58, %v2548_v46  ;;  %v2586_v58 = vld [vmem:[#allocation8 + $0x1a8] sm:$0xf]  ;;  %v3129_v46 = vld [vmem:[#allocation8 + $0x1ac] sm:$0xf] }
  0x75   :  { %1075 = vmatpush.bf16.msra.mxu2 %v2423_v45  ;;  %v2547_v45 = vor.u32 %v3122_v44, %v2546_v43  ;;  %v2607_v43 = vor.u32 %v3133_v39, %v2604_v62 }
  0x76   :  { %1088 = vmatpush.bf16.msra.mxu3 %v2551_v49 }
  0x77   :  { %1050 = vmatpush.bf16.msra.mxu0 %v2403_v50  ;;  %v2427_v50 = vor.u32 %v3091_v48, %v2426_v47  ;;  %1062 = vmatpush.bf16.msra.mxu1 %v2547_v45  ;;  %v3131_v45 = vld [vmem:[#allocation8 + $0x1b4] sm:$0xf0]  ;;  %v2588_v48 = vld [vmem:[#allocation8 + $0x1b8] sm:$0xf0] }
  0x78   :  { %v2587_v47 = vor.u32 %v3131_v45, %v2586_v58 }
  0x79   :  { %1076 = vmatpush.bf16.msra.mxu2 %v2407_v51  ;;  %v3089_v51 = vld [vmem:[#allocation8 + $0x6c] sm:$0xf] }
  0x7a   :  { %v2431_v55 = vor.u32 %v3089_v51, %v2428_v52 }
  0x7b   :  { %1051 = vmatpush.bf16.msra.mxu0 %v2387_v59  ;;  %v3116_v59 = vld [vmem:[#allocation8 + $0x144] sm:$0xf]  ;;  %1063 = vmatpush.bf16.msra.mxu1 %v2531_v61 }
  0x7d   :  { %1077 = vmatpush.bf16.msra.mxu2 %v2391_v60  ;;  %v2532_v60 = vld [vmem:[#allocation8 + $0x150] sm:$0xf0] }
  0x7e   :  { %v2535_v63 = vor.u32 %v3116_v59, %v2532_v60 }
  0x7f   :  { %1052 = vmatpush.bf16.msra.mxu0 %v2371_v6  ;;  %v3114_v6 = vld [vmem:[#allocation8 + $0x12c] sm:$0xf0] }
  0x80   :  { %v2515_v11 = vor.u32 %v3114_v6, %v2514_v5  ;;  %1089 = vmatpush.bf16.msra.mxu3 %v2535_v63  ;;  %v2572_v63 = vld [vmem:[#allocation8 + $0x198] sm:$0xf0]  ;;  %v3121_v5 = vld [vmem:[#allocation8 + $0x16c] sm:$0xf] }
  0x81   :  { %1078 = vmatpush.bf16.msra.mxu2 %v2375_v7  ;;  %v2415_v7 = vor.u32 %v3085_v2, %v2412_v4  ;;  %v2575_v1 = vor.u32 %v3125_v56, %v2572_v63  ;;  %v3123_v4 = vld [vmem:[#allocation8 + $0x174] sm:$0xf0] }
  0x82   :  { %1064 = vmatpush.bf16.msra.mxu1 %v2515_v11 }
  0x83   :  { %1097 = vmatpush.bf16.msrb.mxu0 %v2491_v8  ;;  %v3112_v8 = vld [vmem:[#allocation8 + $0x124] sm:$0xf] }
  0x85   :  { %1123 = vmatpush.bf16.msrb.mxu2 %v2495_v9  ;;  %v2516_v9 = vld [vmem:[#allocation8 + $0x130] sm:$0xf0] }
  0x86   :  { %v2519_v15 = vor.u32 %v3112_v8, %v2516_v9  ;;  %v2556_v8 = vld [vmem:[#allocation8 + $0x178] sm:$0xf0]  ;;  %v2538_v9 = vld [vmem:[#allocation8 + $0x148] sm:$0xf] }
  0x87   :  { %1098 = vmatpush.bf16.msrb.mxu0 %v2475_v18  ;;  %v3110_v18 = vld [vmem:[#allocation8 + $0x10c] sm:$0xf0]  ;;  %v2559_v12 = vor.u32 %v3121_v5, %v2556_v8  ;;  %v2674_v5 = vld [vmem:[#allocation10 + $0x60] sm:$0xf] }
  0x88   :  { %v2499_v26 = vor.u32 %v3110_v18, %v2498_v17  ;;  %1090 = vmatpush.bf16.msra.mxu3 %v2519_v15  ;;  %v2543_v17 = vor.u32 %v3117_v13, %v2540_v14  ;;  %v2522_v18 = vld [vmem:[#allocation8 + $0x128] sm:$0xf]  ;;  %v2746_v13 = vld [vmem:[#allocation10 + $0xf0] sm:$0xf]  ;;  %v3171_v14 = vld [vmem:[#allocation10 + $0xf4] sm:$0xf0] }
  0x89   :  { %1124 = vmatpush.bf16.msrb.mxu2 %v2479_v21  ;;  %v2500_v21 = vld [vmem:[#allocation8 + $0x110] sm:$0xf0] }
  0x8a   :  { %v2503_v28 = vor.u32 %v3108_v19, %v2500_v21  ;;  %1065 = vmatpush.bf16.msra.mxu1 %v2499_v26  ;;  %v3115_v19 = vld [vmem:[#allocation8 + $0x134] sm:$0xf0]  ;;  %v2524_v21 = vld [vmem:[#allocation8 + $0x138] sm:$0xf0]  ;;  %v3109_v26 = vld [vmem:[#allocation8 + $0x10c] sm:$0xf] }
  0x8b   :  { %1099 = vmatpush.bf16.msrb.mxu0 %v2459_v30  ;;  %v2383_v30 = vor.u32 %v3077_v24, %v2380_v25  ;;  %v2523_v22 = vor.u32 %v3115_v19, %v2522_v18  ;;  %v2506_v24 = vld [vmem:[#allocation8 + $0x108] sm:$0xf]  ;;  %v3111_v25 = vld [vmem:[#allocation8 + $0x114] sm:$0xf0]  ;;  %v3170_v18 = vld [vmem:[#allocation10 + $0xf4] sm:$0xf] }
  0x8c   :  { %1091 = vmatpush.bf16.msra.mxu3 %v2503_v28  ;;  %v2508_v28 = vld [vmem:[#allocation8 + $0x118] sm:$0xf0] }
  0x8d   :  { %1125 = vmatpush.bf16.msrb.mxu2 %v2463_v33  ;;  %v3137_v33 = vld [vmem:[#allocation8 + $0x1ec] sm:$0xf]  ;;  %v2748_v19 = vld [vmem:[#allocation10 + $0xf8] sm:$0xf0] }
  0x8e   :  { %v2623_v37 = vor.u32 %v3137_v33, %v2620_v35  ;;  %1110 = vmatpush.bf16.msrb.mxu1 %v2619_v34 }
  0x8f   :  { %1100 = vmatpush.bf16.msrb.mxu0 %v2443_v41  ;;  %v2603_v41 = vor.u32 %v3135_v57, %v2602_v38 }
  0x90   :  { %1136 = vmatpush.bf16.msrb.mxu3 %v2623_v37 }
  0x91   :  { %1126 = vmatpush.bf16.msrb.mxu2 %v2447_v53 }
  0x92   :  { %1111 = vmatpush.bf16.msrb.mxu1 %v2603_v41 }
  0x93   :  { %1101 = vmatpush.bf16.msrb.mxu0 %v2427_v50  ;;  %v2591_v50 = vor.u32 %v3129_v46, %v2588_v48  ;;  %v3515_v46 = vmov 8.0  }
  0x94   :  { %1137 = vmatpush.bf16.msrb.mxu3 %v2607_v43  ;;  %3250 = vrcp.f32 %v3515_v46 }
  0x95   :  { %1127 = vmatpush.bf16.msrb.mxu2 %v2431_v55  ;;  %v3127_v55 = vld [vmem:[#allocation8 + $0x194] sm:$0xf0] }
  0x96   :  { %1112 = vmatpush.bf16.msrb.mxu1 %v2587_v47  ;;  %v2571_v61 = vor.u32 %v3127_v55, %v2570_v54  ;;  %v3606_v47 = vld [vmem:[#allocation13 + $0x2] sm:$0xf]  ;;  %v2682_v54 = vld [vmem:[#allocation10 + $0x70] sm:$0xf]  ;;  %v3155_v55 = vld [vmem:[#allocation10 + $0x74] sm:$0xf0] }
  0x97   :  { %1102 = vmatpush.bf16.msrb.mxu0 %v2411_v3  ;;  %v2554_v3 = vld [vmem:[#allocation8 + $0x168] sm:$0xf] }
  0x98   :  { %1138 = vmatpush.bf16.msrb.mxu3 %v2591_v50 }
  0x99   :  { %1128 = vmatpush.bf16.msrb.mxu2 %v2415_v7  ;;  %v2555_v7 = vor.u32 %v3123_v4, %v2554_v3  ;;  %v718_v3 = vperm.slane %v3606_v47, 1 }
  0x9a   :  { %1113 = vmatpush.bf16.msrb.mxu1 %v2571_v61  ;;  %v2684_v61 = vld [vmem:[#allocation10 + $0x78] sm:$0xf0] }
  0x9b   :  { %1103 = vmatpush.bf16.msrb.mxu0 %v2395_v16  ;;  %v2539_v16 = vor.u32 %v3119_v10, %v2538_v9  ;;  %v2676_v10 = vld [vmem:[#allocation10 + $0x68] sm:$0xf0] }
  0x9c   :  { %1139 = vmatpush.bf16.msrb.mxu3 %v2575_v1 }
  0x9d   :  { %1129 = vmatpush.bf16.msrb.mxu2 %v2399_v20  ;;  %v3113_v20 = vld [vmem:[#allocation8 + $0x12c] sm:$0xf] }
  0x9e   :  { %1114 = vmatpush.bf16.msrb.mxu1 %v2555_v7  ;;  %v2527_v23 = vor.u32 %v3113_v20, %v2524_v21  ;;  %v3152_v7 = vld [vmem:[#allocation10 + $0x64] sm:$0xf]  ;;  %v2751_v21 = vor.u32 %v3170_v18, %v2748_v19  ;;  %v3145_v18 = vld [vmem:[#allocation10 + $0x24] sm:$0xf0] }
  0x9f   :  { %1104 = vmatpush.bf16.msrb.mxu0 %v2379_v29  ;;  %v2507_v29 = vor.u32 %v3111_v25, %v2506_v24  ;;  %v3150_v24 = vld [vmem:[#allocation10 + $0x54] sm:$0xf]  ;;  %v3144_v19 = vld [vmem:[#allocation10 + $0x24] sm:$0xf] }
  0xa0   :  { %1140 = vmatpush.bf16.msrb.mxu3 %v2559_v12  ;;  %v2679_v12 = vor.u32 %v3152_v7, %v2676_v10  ;;  %v2652_v7 = vld [vmem:[#allocation10 + $0x38] sm:$0xf0]  ;;  %v3165_v10 = vld [vmem:[#allocation10 + $0xc4] sm:$0xf0] }
  0xa1   :  { %1130 = vmatpush.bf16.msrb.mxu2 %v2383_v30  ;;  %v2511_v30 = vor.u32 %v3109_v26, %v2508_v28 }
  0xa2   :  { %1115 = vmatpush.bf16.msrb.mxu1 %v2539_v16 }
  0xa4   :  { %1141 = vmatpush.bf16.msrb.mxu3 %v2543_v17  ;;  %v2747_v17 = vor.u32 %v3171_v14, %v2746_v13 }
  0xa6   :  { %1116 = vmatpush.bf16.msrb.mxu1 %v2523_v22  ;;  %v2666_v22 = vld [vmem:[#allocation10 + $0x50] sm:$0xf] }
  0xa8   :  { %1142 = vmatpush.bf16.msrb.mxu3 %v2527_v23  ;;  %v3151_v23 = vld [vmem:[#allocation10 + $0x54] sm:$0xf0] }
  0xa9   :  { %v2667_v28 = vor.u32 %v3151_v23, %v2666_v22 }
  0xaa   :  { %1117 = vmatpush.bf16.msrb.mxu1 %v2507_v29  ;;  %v2668_v29 = vld [vmem:[#allocation10 + $0x58] sm:$0xf0] }
  0xac   :  { %1143 = vmatpush.bf16.msrb.mxu3 %v2511_v30 }
  0xbf   :  { %v553_v40 = vpop.f32.mrf.mxu0 }
  0xc0   :  { %v554_v42 = vadd.f32 %v553_v40, %v206_v36  ;;  %v566_v53 = vpop.f32.mrf.mxu1 }
  0xc2   :  { %v567_v44 = vadd.f32 %v566_v53, %v554_v42 }
  0xc7   :  { %v579_v49 = vpop.f32.mrf.mxu2  ;;  %v555_v60 = vpop.f32.mrf.mxu0 }
  0xc8   :  { %v580_v51 = vadd.f32 %v579_v49, %v567_v44  ;;  %v592_v52 = vpop.f32.mrf.mxu3  ;;  %v568_v0 = vpop.f32.mrf.mxu1  ;;  %v3154_v60 = vld [vmem:[#allocation10 + $0x74] sm:$0xf] }
  0xc9   :  { %v3610_v49 = vpop.eup %3250 }
  0xca   :  { %v593_v59 = vadd.f32 %v592_v52, %v580_v51  ;;  %v717_v51 = vperm.slane %v3606_v47, 0  ;;  %v1162_v52 = vmul.f32 8.0, %v3610_v49  ;;  %vm1166_vm0 = vweird.f32 %v3610_v49 }
  0xcc   :  { %v648_v2 = vmax.f32 %v593_v59, 0.0  ;;  %v2683_v59 = vor.u32 %v3155_v55, %v2682_v54  ;;  %v1163_v0 = vsub.f32 1.0, %v1162_v52  ;;  %v3166_v52 = vld [vmem:[#allocation10 + $0xd4] sm:$0xf]  ;;  %v720_v54 = vperm.slane %v3606_v47, 3 }
  0xce   :  { %v650_v6 = vpack.c.bf16 %v648_v2, %v648_v2  ;;  %v2687_v2 = vor.u32 %v3154_v60, %v2684_v61  ;;  %v2732_v60 = vld [vmem:[#allocation10 + $0xd8] sm:$0xf0] }
  0xcf   :  { %v581_v11 = vpop.f32.mrf.mxu2 }
  0xd0   :  { %1053 = vmatmul.bf16.vlgmr.msra.gmra.mxu0 %v650_v6  ;;  %1079 = vmatmul.bf16.vlgmr.msra.gmra.mxu2 %v650_v6  ;;  %v594_v15 = vpop.f32.mrf.mxu3  ;;  %v1164_v11 = vmul.f32 %v3610_v49, %v1163_v0  ;;  %v2650_v0 = vld [vmem:[#allocation10 + $0x30] sm:$0xf] }
  0xd1   :  { %1437 = vmatpush.bf16.msra.mxu0 %v2683_v59  ;;  %1463 = vmatpush.bf16.msra.mxu2 %v2687_v2  ;;  %v3146_v2 = vld [vmem:[#allocation10 + $0x34] sm:$0xf] }
  0xd2   :  { %v1165_v30 = vadd.f32 %v3610_v49, %v1164_v11  ;;  %v3164_v11 = vld [vmem:[#allocation10 + $0xc4] sm:$0xf] }
  0xd5   :  { %1464 = vmatpush.bf16.msra.mxu2 %v2679_v12 }
  0xdf   :  { %v605_v32 = vpop.f32.mrf.mxu0 }
  0xe0   :  { %v606_v33 = vadd.f32 %v605_v32, %v207_v31  ;;  %v618_v34 = vpop.f32.mrf.mxu1  ;;  %1105 = vmatmul.bf16.vlgmr.msrb.gmra.mxu0 %v650_v6  ;;  %1131 = vmatmul.bf16.vlgmr.msrb.gmra.mxu2 %v650_v6  ;;  %v3153_v6 = vld [vmem:[#allocation10 + $0x64] sm:$0xf0]  ;;  %v2671_v32 = vor.u32 %v3150_v24, %v2668_v29  ;;  %v2714_v24 = vld [vmem:[#allocation10 + $0xb0] sm:$0xf] }
  0xe1   :  { %v2675_v9 = vor.u32 %v3153_v6, %v2674_v5 }
  0xe2   :  { %v619_v35 = vadd.f32 %v618_v34, %v606_v33  ;;  %v2738_v33 = vld [vmem:[#allocation10 + $0xe0] sm:$0xf]  ;;  %v3169_v34 = vld [vmem:[#allocation10 + $0xe4] sm:$0xf0]  ;;  %1465 = vmatpush.bf16.msra.mxu2 %v2671_v32  ;;  %v2716_v32 = vld [vmem:[#allocation10 + $0xb8] sm:$0xf0] }
  0xe3   :  { %1438 = vmatpush.bf16.msra.mxu0 %v2675_v9  ;;  %v2722_v9 = vld [vmem:[#allocation10 + $0xc0] sm:$0xf] }
  0xe7   :  { %v631_v36 = vpop.f32.mrf.mxu2  ;;  %v607_v57 = vpop.f32.mrf.mxu0  ;;  %1439 = vmatpush.bf16.msra.mxu0 %v2667_v28  ;;  %v3162_v28 = vld [vmem:[#allocation10 + $0xb4] sm:$0xf] }
  0xe8   :  { %v632_v37 = vadd.f32 %v631_v36, %v619_v35  ;;  %v644_v38 = vpop.f32.mrf.mxu3  ;;  %v620_v39 = vpop.f32.mrf.mxu1  ;;  %v3168_v35 = vld [vmem:[#allocation10 + $0xe4] sm:$0xf]  ;;  %v2740_v57 = vld [vmem:[#allocation10 + $0xe8] sm:$0xf0] }
  0xe9   :  { %v2743_v39 = vor.u32 %v3168_v35, %v2740_v57  ;;  %v2719_v35 = vor.u32 %v3162_v28, %v2716_v32 }
  0xea   :  { %v645_v40 = vadd.f32 %v644_v38, %v632_v37  ;;  %v2739_v38 = vor.u32 %v3169_v34, %v2738_v33 }
  0xec   :  { %v649_v41 = vmax.f32 %v645_v40, 0.0  ;;  %v2658_v40 = vld [vmem:[#allocation10 + $0x40] sm:$0xf] }
  0xee   :  { %v651_v62 = vpack.c.bf16 %v649_v41, %v649_v41  ;;  %v3149_v41 = vld [vmem:[#allocation10 + $0x44] sm:$0xf0] }
  0xef   :  { %v633_v42 = vpop.f32.mrf.mxu2 }
  0xf0   :  { %v646_v53 = vpop.f32.mrf.mxu3  ;;  %1066 = vmatmul.bf16.vlgmr.msra.gmra.mxu1 %v651_v62  ;;  %1092 = vmatmul.bf16.vlgmr.msra.gmra.mxu3 %v651_v62  ;;  %v719_v42 = vperm.slane %v3606_v47, 2 }
  0xf1   :  { %1450 = vmatpush.bf16.msra.mxu1 %v2747_v17  ;;  %1476 = vmatpush.bf16.msra.mxu3 %v2751_v21  ;;  %v2642_v17 = vld [vmem:[#allocation10 + $0x20] sm:$0xf] }
  0xf2   :  { %v2643_v22 = vor.u32 %v3145_v18, %v2642_v17  ;;  %v2692_v18 = vld [vmem:[#allocation10 + $0x88] sm:$0xf0] }
  0xf5   :  { %1451 = vmatpush.bf16.msra.mxu1 %v2739_v38  ;;  %1477 = vmatpush.bf16.msra.mxu3 %v2743_v39  ;;  %v3142_v38 = vld [vmem:[#allocation10 + $0x14] sm:$0xf] }
 0x100   :  { %1118 = vmatmul.bf16.vlgmr.msrb.gmra.mxu1 %v651_v62  ;;  %1144 = vmatmul.bf16.vlgmr.msrb.gmra.mxu3 %v651_v62  ;;  %v3148_v62 = vld [vmem:[#allocation10 + $0x44] sm:$0xf] }
 0x14d   :  { %v1054_v27 = vpop.f32.mrf.mxu0 }
 0x14e   :  { %v1055_v56 = vadd.f32 %v1054_v27, %v717_v51  ;;  %v3167_v51 = vld [vmem:[#allocation10 + $0xd4] sm:$0xf0] }
 0x153   :  { %v1080_v43 = vpop.f32.mrf.mxu2 }
 0x154   :  { %v1081_v15 = vadd.f32 %v1080_v43, %v718_v3  ;;  %v2659_v43 = vor.u32 %v3149_v41, %v2658_v40  ;;  %v2636_v40 = vld [vmem:[#allocation10 + $0x18] sm:$0xf0] }
 0x155   :  { %v1056_v44 = vpop.f32.mrf.mxu0 }
 0x156   :  { %v2660_v44 = vld [vmem:[#allocation10 + $0x48] sm:$0xf0]  ;;  %1440 = vmatpush.bf16.msra.mxu0 %v2659_v43  ;;  %v3160_v43 = vld [vmem:[#allocation10 + $0xa4] sm:$0xf] }
 0x157   :  { %v2663_v46 = vor.u32 %v3148_v62, %v2660_v44 }
 0x159   :  { %1466 = vmatpush.bf16.msra.mxu2 %v2663_v46 }
 0x15b   :  { %v1082_v58 = vpop.f32.mrf.mxu2 }
 0x15c   :  { %v3630_v58 = vsel %vm1166_vm0, %v3610_v49, %v1165_v30 }
 0x15d   :  { %v3604_v45 = vpop.f32.mrf.mxu0 }
 0x15e   :  { %v1107_v49 = vadd.f32 %v3604_v45, %v719_v42  ;;  %v2723_v45 = vor.u32 %v3165_v10, %v2722_v9 }
 0x163   :  { %v3608_v48 = vpop.f32.mrf.mxu2 }
 0x164   :  { %v1133_v33 = vadd.f32 %v3608_v48, %v720_v54  ;;  %v3161_v48 = vld [vmem:[#allocation10 + $0xa4] sm:$0xf0] }
 0x165   :  { %v1108_v50 = vpop.f32.mrf.mxu0  ;;  %v3141_v54 = vld [vmem:[#allocation10 + $0x4] sm:$0xf0] }
 0x166   :  { %v2730_v50 = vld [vmem:[#allocation10 + $0xd0] sm:$0xf] }
 0x167   :  { %v2731_v59 = vor.u32 %v3167_v51, %v2730_v50  ;;  %v2708_v51 = vld [vmem:[#allocation10 + $0xa8] sm:$0xf0] }
 0x169   :  { %1452 = vmatpush.bf16.msra.mxu1 %v2731_v59 }
 0x16b   :  { %v1134_v1 = vpop.f32.mrf.mxu2 }
 0x16c   :  { %v3147_v1 = vld [vmem:[#allocation10 + $0x34] sm:$0xf0] }
 0x16d   :  { %v1067_v63 = vpop.f32.mrf.mxu1  ;;  %v2651_v6 = vor.u32 %v3147_v1, %v2650_v0  ;;  %1453 = vmatpush.bf16.msra.mxu1 %v2723_v45  ;;  %v2698_v0 = vld [vmem:[#allocation10 + $0x90] sm:$0xf]  ;;  %v3159_v1 = vld [vmem:[#allocation10 + $0x94] sm:$0xf0]  ;;  %v3156_v45 = vld [vmem:[#allocation10 + $0x84] sm:$0xf] }
 0x16e   :  { %v3615_v4 = vadd.f32 %v1067_v63, %v1055_v56  ;;  %v2735_v63 = vor.u32 %v3166_v52, %v2732_v60  ;;  %v2626_v52 = vld [vmem:[#allocation10] sm:$0xf]  ;;  %v3140_v60 = vld [vmem:[#allocation10 + $0x4] sm:$0xf] }
 0x16f   :  { %1441 = vmatpush.bf16.msra.mxu0 %v2651_v6  ;;  %v2627_v59 = vor.u32 %v3141_v54, %v2626_v52  ;;  %v2700_v6 = vld [vmem:[#allocation10 + $0x98] sm:$0xf0]  ;;  %v3663_v52 = vld [vmem:[#allocation13 + $0x6] sm:$0x3] }
 0x170   :  { %v1149_v8 = vrot.slane %v3615_v4, 4  ;;  %1478 = vmatpush.bf16.msra.mxu3 %v2735_v63 }
 0x172   :  { %v1150_v16 = vadd.f32 %v1149_v8, %v3615_v4  ;;  %v2655_v8 = vor.u32 %v3146_v2, %v2652_v7 }
 0x173   :  { %v1093_v20 = vpop.f32.mrf.mxu3  ;;  %1442 = vmatpush.bf16.msra.mxu0 %v2643_v22 }
 0x174   :  { %v1151_v25 = vrot.slane %v1150_v16, 2  ;;  %v3620_v26 = vadd.f32 %v1093_v20, %v1081_v15  ;;  %v2724_v15 = vld [vmem:[#allocation10 + $0xc8] sm:$0xf0]  ;;  %1467 = vmatpush.bf16.msra.mxu2 %v2655_v8 }
 0x175   :  { %v1069_v31 = vpop.f32.mrf.mxu1 }
 0x176   :  { %v1152_v36 = vadd.f32 %v1151_v25, %v1150_v16  ;;  %v1155_v37 = vrot.slane %v3620_v26, 4  ;;  %v2727_v16 = vor.u32 %v3164_v11, %v2724_v15  ;;  %v3163_v25 = vld [vmem:[#allocation10 + $0xb4] sm:$0xf0]  ;;  %v2690_v11 = vld [vmem:[#allocation10 + $0x80] sm:$0xf] }
 0x177   :  { %v2715_v31 = vor.u32 %v3163_v25, %v2714_v24  ;;  %v3202_v24 = vld [vmem:[#allocation11 + $0xec] sm:$0xf0]  ;;  %v3200_v25 = vld [vmem:[#allocation11 + $0xe4] sm:$0xf] }
 0x178   :  { %v1153_v53 = vrot.slane %v1152_v36, 1  ;;  %v1156_v27 = vadd.f32 %v1155_v37, %v3620_v26  ;;  %1479 = vmatpush.bf16.msra.mxu3 %v2727_v16  ;;  %v3143_v37 = vld [vmem:[#allocation10 + $0x14] sm:$0xf0] }
 0x179   :  { %1454 = vmatpush.bf16.msra.mxu1 %v2715_v31  ;;  %v3198_v31 = vld [vmem:[#allocation11 + $0xcc] sm:$0xf0] }
 0x17a   :  { %v1154_v55 = vadd.f32 %v1153_v53, %v1152_v36  ;;  %v1157_v56 = vrot.slane %v1156_v27, 2  ;;  %v2634_v36 = vld [vmem:[#allocation10 + $0x10] sm:$0xf]  ;;  %v2639_v53 = vor.u32 %v3142_v38, %v2636_v40  ;;  %v2996_v40 = vld [vmem:[#allocation11 + $0x1f0] sm:$0xf0] }
 0x17b   :  { %v1095_v61 = vpop.f32.mrf.mxu3  ;;  %v2635_v42 = vor.u32 %v3143_v37, %v2634_v36  ;;  %v2994_v36 = vld [vmem:[#allocation11 + $0x1e0] sm:$0xf]  ;;  %v3234_v38 = vld [vmem:[#allocation11 + $0x1ec] sm:$0xf0] }
 0x17c   :  { %v1168_v3 = vmul.f32 %v3630_v58, %v1154_v55  ;;  %v1158_v5 = vadd.f32 %v1157_v56, %v1156_v27  ;;  %1480 = vmatpush.bf16.msra.mxu3 %v2719_v35  ;;  %v2706_v27 = vld [vmem:[#allocation10 + $0xa0] sm:$0xf]  ;;  %v2628_v61 = vld [vmem:[#allocation10 + $0x8] sm:$0xf0]  ;;  %v2852_v35 = vld [vmem:[#allocation11 + $0xd0] sm:$0xf0] }
 0x17d   :  { %v1119_v47 = vpop.f32.mrf.mxu1  ;;  %v2707_v50 = vor.u32 %v3161_v48, %v2706_v27  ;;  %1443 = vmatpush.bf16.msra.mxu0 %v2635_v42  ;;  %v2631_v63 = vor.u32 %v3140_v60, %v2628_v61  ;;  %v2995_v42 = vor.u32 %v3234_v38, %v2994_v36  ;;  %v2834_v27 = vld [vmem:[#allocation11 + $0xa0] sm:$0xf]  ;;  %v3194_v48 = vld [vmem:[#allocation11 + $0xac] sm:$0xf0] }
 0x17e   :  { %v3636_v12 = vsub.f32 %v3615_v4, %v1168_v3  ;;  %v1159_v13 = vrot.slane %v1158_v5, 1  ;;  %v3638_v14 = vadd.f32 %v1119_v47, %v1107_v49  ;;  %v2644_v4 = vld [vmem:[#allocation10 + $0x28] sm:$0xf0]  ;;  %v2699_v3 = vor.u32 %v3159_v1, %v2698_v0  ;;  %v2818_v60 = vld [vmem:[#allocation11 + $0x80] sm:$0xf] }
 0x17f   :  { %v2647_v23 = vor.u32 %v3144_v19, %v2644_v4  ;;  %1455 = vmatpush.bf16.msra.mxu1 %v2707_v50  ;;  %v2695_v19 = vor.u32 %v3156_v45, %v2692_v18  ;;  %v3230_v50 = vld [vmem:[#allocation11 + $0x1cc] sm:$0xf0]  ;;  %v3188_v0 = vld [vmem:[#allocation11 + $0x84] sm:$0xf]  ;;  %v2820_v1 = vld [vmem:[#allocation11 + $0x90] sm:$0xf0] }
 0x180   :  { %v1172_v20 = vmul.f32 %v3636_v12, %v3636_v12  ;;  %v1160_v21 = vadd.f32 %v1159_v13, %v1158_v5  ;;  %2072 = vst [vmem:[#allocation15 + $0x10] sm:$0xff] %v3638_v14  ;;  %v3158_v5 = vld [vmem:[#allocation10 + $0x94] sm:$0xf]  ;;  %v1226_v10 = vmul.f32 0.5, %v3638_v14  ;;  %v3157_v13 = vld [vmem:[#allocation10 + $0x84] sm:$0xf0]  ;;  %v2823_v18 = vor.u32 %v3188_v0, %v2820_v1 }
 0x181   :  { %1468 = vmatpush.bf16.msra.mxu2 %v2647_v23  ;;  %1444 = vmatpush.bf16.msra.mxu0 %v2627_v59  ;;  %v2703_v47 = vor.u32 %v3158_v5, %v2700_v6  ;;  %v2691_v17 = vor.u32 %v3157_v13, %v2690_v11  ;;  %v2866_v23 = vld [vmem:[#allocation11 + $0xe0] sm:$0xf]  ;;  %v3190_v61 = vld [vmem:[#allocation11 + $0x8c] sm:$0xf0]  ;;  %v3224_v6 = vld [vmem:[#allocation11 + $0x1a4] sm:$0xf] }
 0x182   :  { %v1174_v29 = vrot.slane %v1172_v20, 4  ;;  %v1169_v30 = vmul.f32 %v3630_v58, %v1160_v21  ;;  %v3654_v4 = vmul.f32 1.442695, %v1226_v10  ;;  %v2867_v28 = vor.u32 %v3202_v24, %v2866_v23  ;;  %v3226_v5 = vld [vmem:[#allocation11 + $0x1ac] sm:$0xf0] }
 0x183   :  { %v1145_v34 = vpop.f32.mrf.mxu3  ;;  %1456 = vmatpush.bf16.msra.mxu1 %v2699_v3  ;;  %v2802_v11 = vld [vmem:[#allocation11 + $0x60] sm:$0xf]  ;;  %v2819_v45 = vor.u32 %v3190_v61, %v2818_v60  ;;  %v3184_v24 = vld [vmem:[#allocation11 + $0x64] sm:$0xf]  ;;  %v2772_v61 = vld [vmem:[#allocation11 + $0x30] sm:$0xf0] }
 0x184   :  { %v1175_v57 = vadd.f32 %v1174_v29, %v1172_v20  ;;  %v3646_v39 = vsub.f32 %v3620_v26, %v1169_v30  ;;  %v1146_v41 = vadd.f32 %v1145_v34, %v1133_v33  ;;  %v2711_v26 = vor.u32 %v3160_v43, %v2708_v51  ;;  %v2868_v29 = vld [vmem:[#allocation11 + $0xf0] sm:$0xf0]  ;;  %v2850_v30 = vld [vmem:[#allocation11 + $0xc0] sm:$0xf]  ;;  %v3196_v34 = vld [vmem:[#allocation11 + $0xc4] sm:$0xf] }
 0x185   :  { %v1121_v62 = vpop.f32.mrf.mxu1  ;;  %1469 = vmatpush.bf16.msra.mxu2 %v2639_v53  ;;  %v2871_v33 = vor.u32 %v3200_v25, %v2868_v29  ;;  %1886 = vmatpush.bf16.msrb.mxu0 %v2867_v28  ;;  %v2851_v37 = vor.u32 %v3198_v31, %v2850_v30  ;;  %v3192_v43 = vld [vmem:[#allocation11 + $0xa4] sm:$0xf]  ;;  %v2804_v25 = vld [vmem:[#allocation11 + $0x70] sm:$0xf0]  ;;  %v2786_v38 = vld [vmem:[#allocation11 + $0x40] sm:$0xf] }
 0x186   :  { %v1176_v44 = vrot.slane %v1175_v57, 2  ;;  %v1173_v46 = vmul.f32 %v3646_v39, %v3646_v39  ;;  %2073 = vst [vmem:[#allocation15 + $0x18] sm:$0xff] %v1146_v41  ;;  %1481 = vmatpush.bf16.msra.mxu3 %v2711_v26  ;;  %v1227_v22 = vmul.f32 0.5, %v1146_v41  ;;  %v2855_v62 = vor.u32 %v3196_v34, %v2852_v35  ;;  %v3228_v51 = vld [vmem:[#allocation11 + $0x1c4] sm:$0xf] }
 0x187   :  { %1457 = vmatpush.bf16.msra.mxu1 %v2691_v17  ;;  %v2980_v26 = vld [vmem:[#allocation11 + $0x1d0] sm:$0xf0]  ;;  %v3218_v34 = vld [vmem:[#allocation11 + $0x16c] sm:$0xf0]  ;;  %v3216_v35 = vld [vmem:[#allocation11 + $0x164] sm:$0xf] }
 0x188   :  { %v1177_v55 = vadd.f32 %v1176_v44, %v1175_v57  ;;  %v1180_v56 = vrot.slane %v1173_v46, 4  ;;  %v3232_v57 = vld [vmem:[#allocation11 + $0x1e4] sm:$0xf]  ;;  %v2836_v44 = vld [vmem:[#allocation11 + $0xb0] sm:$0xf0]  ;;  %v2983_v59 = vor.u32 %v3228_v51, %v2980_v26 }
 0x189   :  { %1470 = vmatpush.bf16.msra.mxu2 %v2631_v63  ;;  %v2999_v53 = vor.u32 %v3232_v57, %v2996_v40  ;;  %1887 = vmatpush.bf16.msrb.mxu0 %v2851_v37  ;;  %v2839_v63 = vor.u32 %v3192_v43, %v2836_v44  ;;  %v2807_v37 = vor.u32 %v3184_v24, %v2804_v25  ;;  %v3182_v57 = vld [vmem:[#allocation11 + $0x4c] sm:$0xf0]  ;;  %v2932_v40 = vld [vmem:[#allocation11 + $0x170] sm:$0xf0]  ;;  %v2770_v51 = vld [vmem:[#allocation11 + $0x20] sm:$0xf] }
 0x18a   :  { %v1178_v2 = vrot.slane %v1177_v55, 1  ;;  %v1181_v49 = vadd.f32 %v1180_v56, %v1173_v46  ;;  %1482 = vmatpush.bf16.msra.mxu3 %v2703_v47  ;;  %v1189_v47 = vperm.slane %v3663_v52, 0  ;;  %v2788_v43 = vld [vmem:[#allocation11 + $0x50] sm:$0xf0]  ;;  %v3214_v0 = vld [vmem:[#allocation11 + $0x14c] sm:$0xf0] }
 0x18b   :  { %v1147_v7 = vpop.f32.mrf.mxu3  ;;  %1899 = vmatpush.bf16.msrb.mxu1 %v2995_v42  ;;  %v3212_v1 = vld [vmem:[#allocation11 + $0x144] sm:$0xf]  ;;  %v2876_v25 = vld [vmem:[#allocation11 + $0xf8] sm:$0xf0] }
 0x18c   :  { %v1179_v8 = vadd.f32 %v1178_v2, %v1177_v55  ;;  %v1182_v9 = vrot.slane %v1181_v49, 2  ;;  %v2835_v55 = vor.u32 %v3194_v48, %v2834_v27  ;;  %v2962_v2 = vld [vmem:[#allocation11 + $0x1a0] sm:$0xf]  ;;  %v2964_v7 = vld [vmem:[#allocation11 + $0x1b0] sm:$0xf0]  ;;  %v1193_v36 = vmul.f32 %v1189_v47, %v3636_v12 }
 0x18d   :  { %1912 = vmatpush.bf16.msrb.mxu2 %v2871_v33  ;;  %v2967_v10 = vor.u32 %v3224_v6, %v2964_v7  ;;  %v2930_v33 = vld [vmem:[#allocation11 + $0x160] sm:$0xf]  ;;  %v1232_v27 = vld [vmem:[#allocation5] sm:$0xff]  ;;  %v3180_v48 = vld [vmem:[#allocation11 + $0x44] sm:$0xf] }
 0x18e   :  { %v1186_v15 = vmul.f32 %v1179_v8, %v3630_v58  ;;  %v1183_v16 = vadd.f32 %v1182_v9, %v1181_v49  ;;  %1483 = vmatpush.bf16.msra.mxu3 %v2695_v19  ;;  %v3667_v49 = vld [vmem:[#allocation13 + $0x8] sm:$0x3]  ;;  %v1230_v8 = vmul.f32 1.442695, %v1227_v22  ;;  %v2963_v9 = vor.u32 %v3226_v5, %v2962_v2  ;;  %1888 = vmatpush.bf16.msrb.mxu0 %v2835_v55  ;;  %v3222_v19 = vld [vmem:[#allocation11 + $0x18c] sm:$0xf0] }
 0x18f   :  { %v2948_v22 = vld [vmem:[#allocation11 + $0x190] sm:$0xf0]  ;;  %v1220_v28 = vperm.slane %v3667_v49, 0  ;;  %v2931_v12 = vor.u32 %v3218_v34, %v2930_v33  ;;  %v3178_v55 = vld [vmem:[#allocation11 + $0x2c] sm:$0xf0]  ;;  %v2791_v60 = vor.u32 %v3180_v48, %v2788_v43  ;;  %v1221_v5 = vperm.slane %v3667_v49, 1 }
 0x190   :  { %v3652_v20 = vadd.f32 1e-05, %v1186_v15  ;;  %v1184_v21 = vrot.slane %v1183_v16, 1  ;;  %v3186_v15 = vld [vmem:[#allocation11 + $0x6c] sm:$0xf0] }
 0x191   :  { %1913 = vmatpush.bf16.msrb.mxu2 %v2855_v62  ;;  %v2916_v2 = vld [vmem:[#allocation11 + $0x150] sm:$0xf0]  ;;  %v3210_v49 = vld [vmem:[#allocation11 + $0x12c] sm:$0xf0]  ;;  %v3002_v43 = vld [vmem:[#allocation11 + $0x1e8] sm:$0xf] }
 0x192   :  { %3252 = vrsqrt.f32 %v3652_v20  ;;  %v1185_v14 = vadd.f32 %v1184_v21, %v1183_v16  ;;  %1925 = vmatpush.bf16.msrb.mxu3 %v2999_v53  ;;  %v2946_v16 = vld [vmem:[#allocation11 + $0x180] sm:$0xf]  ;;  %v3220_v21 = vld [vmem:[#allocation11 + $0x184] sm:$0xf]  ;;  %vm1203_vm2 = vweird.f32 %v3652_v20  ;;  %1889 = vmatpush.bf16.msrb.mxu0 %v2819_v45  ;;  %v2884_v48 = vld [vmem:[#allocation11 + $0x110] sm:$0xf0] }
 0x193   :  { %v2947_v29 = vor.u32 %v3222_v19, %v2946_v16  ;;  %v2951_v30 = vor.u32 %v3220_v21, %v2948_v22  ;;  %v2898_v16 = vld [vmem:[#allocation11 + $0x120] sm:$0xf]  ;;  %v2756_v19 = vld [vmem:[#allocation11 + $0x10] sm:$0xf0] }
 0x194   :  { %v1187_v32 = vmul.f32 %v1185_v14, %v3630_v58  ;;  %v2978_v58 = vld [vmem:[#allocation11 + $0x1c0] sm:$0xf] }
 0x195   :  { %v2979_v56 = vor.u32 %v3230_v50, %v2978_v58  ;;  %1914 = vmatpush.bf16.msrb.mxu2 %v2839_v63  ;;  %v1190_v58 = vperm.slane %v3663_v52, 1  ;;  %v2935_v50 = vor.u32 %v3216_v35, %v2932_v40  ;;  %v2914_v63 = vld [vmem:[#allocation11 + $0x140] sm:$0xf]  ;;  %v2858_v35 = vld [vmem:[#allocation11 + $0xc8] sm:$0xf] }
 0x196   :  { %v3658_v41 = vadd.f32 1e-05, %v1187_v32  ;;  %1926 = vmatpush.bf16.msrb.mxu3 %v2983_v59  ;;  %v2803_v32 = vor.u32 %v3186_v15, %v2802_v11  ;;  %v2754_v11 = vld [vmem:[#allocation11] sm:$0xf]  ;;  %v2919_v15 = vor.u32 %v3212_v1, %v2916_v2  ;;  %v2988_v1 = vld [vmem:[#allocation11 + $0x1d8] sm:$0xf0] }
 0x197   :  { %1900 = vmatpush.bf16.msrb.mxu1 %v2979_v56  ;;  %v2882_v40 = vld [vmem:[#allocation11 + $0x100] sm:$0xf] }
 0x198   :  { %v3660_v46 = vpop.eup %3252  ;;  %3254 = vrsqrt.f32 %v3658_v41  ;;  %1890 = vmatpush.bf16.msrb.mxu0 %v2803_v32  ;;  %vm1213_vm5 = vweird.f32 %v3658_v41 }
 0x199   :  { %v1198_v54 = vmul.f32 %v3660_v46, %v3652_v20  ;;  %vm1204_vm1 = vweird.f32 %v3660_v46  ;;  %3256 = vpow2.f32 %v3654_v4  ;;  %1915 = vmatpush.bf16.msrb.mxu2 %v2823_v18  ;;  %v3172_v18 = vld [vmem:[#allocation11 + $0x4] sm:$0xf]  ;;  %v2899_v4 = vor.u32 %v3210_v49, %v2898_v16  ;;  %v3185_v16 = vld [vmem:[#allocation11 + $0x6c] sm:$0xf] }
 0x19a   :  { %vm3680_vm3 = vmor %vm1203_vm2, %vm1204_vm1  ;;  %1927 = vmatpush.bf16.msrb.mxu3 %v2967_v10  ;;  %3258 = vpow2.f32 %v1230_v8  ;;  %v1233_v8 = vld [vmem:[#allocation5 + $0x8] sm:$0xff]  ;;  %v2915_v10 = vor.u32 %v3214_v0, %v2914_v63 }
 0x19b   :  { %v1199_v3 = vmul.f32 %v3660_v46, %v1198_v54  ;;  %1901 = vmatpush.bf16.msrb.mxu1 %v2963_v9  ;;  %v2787_v54 = vor.u32 %v3182_v57, %v2786_v38  ;;  %v2771_v9 = vor.u32 %v3178_v55, %v2770_v51  ;;  %v2860_v57 = vld [vmem:[#allocation11 + $0xd8] sm:$0xf0]  ;;  %v3195_v55 = vld [vmem:[#allocation11 + $0xb4] sm:$0xf0] }
 0x19c   :  { %v3231_v63 = vld [vmem:[#allocation11 + $0x1d4] sm:$0xf0] }
 0x19d   :  { %v1200_v13 = vmul.f32 0.5, %v1199_v3  ;;  %1916 = vmatpush.bf16.msrb.mxu2 %v2807_v37  ;;  %v1194_v3 = vmul.f32 %v1190_v58, %v3646_v39  ;;  %1891 = vmatpush.bf16.msrb.mxu0 %v2787_v54  ;;  %v3197_v37 = vld [vmem:[#allocation11 + $0xcc] sm:$0xf]  ;;  %v3235_v58 = vld [vmem:[#allocation11 + $0x1f4] sm:$0xf0] }
 0x19e   :  { %v3673_v17 = vpop.eup %3254  ;;  %1928 = vmatpush.bf16.msrb.mxu3 %v2951_v30  ;;  %v3003_v51 = vor.u32 %v3235_v58, %v3002_v43  ;;  %v2842_v54 = vld [vmem:[#allocation11 + $0xa8] sm:$0xf]  ;;  %v3213_v43 = vld [vmem:[#allocation11 + $0x14c] sm:$0xf] }
 0x19f   :  { %v1201_v14 = vsub.f32 1.5, %v1200_v13  ;;  %v1208_v23 = vmul.f32 %v3673_v17, %v3658_v41  ;;  %v3257_v62 = vpop.eup %3256  ;;  %1902 = vmatpush.bf16.msrb.mxu1 %v2947_v29  ;;  %vm1214_vm4 = vweird.f32 %v3673_v17  ;;  %v3174_v13 = vld [vmem:[#allocation11 + $0xc] sm:$0xf0]  ;;  %v2900_v29 = vld [vmem:[#allocation11 + $0x130] sm:$0xf0] }
 0x1a0   :  { %v1234_v59 = vmul.f32 %v3257_v62, %v1232_v27  ;;  %vm1215_vm6 = vmor %vm1213_vm5, %vm1214_vm4  ;;  %v3259_v7 = vpop.eup %3258  ;;  %v2755_v24 = vor.u32 %v3174_v13, %v2754_v11  ;;  %v3206_v62 = vld [vmem:[#allocation11 + $0x10c] sm:$0xf0]  ;;  %v3204_v27 = vld [vmem:[#allocation11 + $0x104] sm:$0xf] }
 0x1a1   :  { %v1202_v31 = vmul.f32 %v3660_v46, %v1201_v14  ;;  %v1209_v20 = vmul.f32 %v3673_v17, %v1208_v23  ;;  %1917 = vmatpush.bf16.msrb.mxu2 %v2791_v60  ;;  %v1235_v22 = vmul.f32 %v3259_v7, %v1233_v8  ;;  %v3203_v14 = vld [vmem:[#allocation11 + $0xf4] sm:$0xf0]  ;;  %v3201_v23 = vld [vmem:[#allocation11 + $0xec] sm:$0xf]  ;;  %1892 = vmatpush.bf16.msrb.mxu0 %v2771_v9  ;;  %v2970_v9 = vld [vmem:[#allocation11 + $0x1a8] sm:$0xf] }
 0x1a2   :  { %1929 = vmatpush.bf16.msrb.mxu3 %v2935_v50  ;;  %v2879_v33 = vor.u32 %v3201_v23, %v2876_v25  ;;  %v3004_v50 = vld [vmem:[#allocation11 + $0x1f8] sm:$0xf0]  ;;  %v2794_v25 = vld [vmem:[#allocation11 + $0x48] sm:$0xf] }
 0x1a3   :  { %v1206_v42 = vsel %vm3680_vm3, %v3660_v46, %v1202_v31  ;;  %v1210_v53 = vmul.f32 0.5, %v1209_v20  ;;  %v3176_v46 = vld [vmem:[#allocation11 + $0x24] sm:$0xf]  ;;  %1903 = vmatpush.bf16.msrb.mxu1 %v2931_v12  ;;  %v2759_v31 = vor.u32 %v3172_v18, %v2756_v19  ;;  %v3233_v12 = vld [vmem:[#allocation11 + $0x1ec] sm:$0xf] }
 0x1a4   :  { %v1217_v44 = vmul.f32 %v1206_v42, %v1193_v36  ;;  %v2775_v41 = vor.u32 %v3176_v46, %v2772_v61  ;;  %v3199_v36 = vld [vmem:[#allocation11 + $0xd4] sm:$0xf0]  ;;  %v2863_v42 = vor.u32 %v3197_v37, %v2860_v57  ;;  %v3193_v46 = vld [vmem:[#allocation11 + $0xac] sm:$0xf]  ;;  %v2986_v61 = vld [vmem:[#allocation11 + $0x1c8] sm:$0xf] }
 0x1a5   :  { %v1211_v26 = vsub.f32 1.5, %v1210_v53  ;;  %1893 = vmatpush.bf16.msrb.mxu0 %v2755_v24  ;;  %v2859_v38 = vor.u32 %v3199_v36, %v2858_v35  ;;  %v2883_v53 = vor.u32 %v3206_v62, %v2882_v40  ;;  %v2987_v0 = vor.u32 %v3231_v63, %v2986_v61  ;;  %v2972_v13 = vld [vmem:[#allocation11 + $0x1b8] sm:$0xf0]  ;;  %v2778_v37 = vld [vmem:[#allocation11 + $0x28] sm:$0xf] }
 0x1a6   :  { %v1224_v56 = vadd.f32 %v1220_v28, %v1217_v44  ;;  %v3208_v28 = vld [vmem:[#allocation11 + $0x124] sm:$0xf]  ;;  %1918 = vmatpush.bf16.msrb.mxu2 %v2775_v41  ;;  %1930 = vmatpush.bf16.msrb.mxu3 %v2919_v15  ;;  %v2887_v44 = vor.u32 %v3204_v27, %v2884_v48  ;;  %v3227_v41 = vld [vmem:[#allocation11 + $0x1b4] sm:$0xf0]  ;;  %v2812_v18 = vld [vmem:[#allocation11 + $0x78] sm:$0xf0] }
 0x1a7   :  { %v1212_v52 = vmul.f32 %v3673_v17, %v1211_v26  ;;  %1904 = vmatpush.bf16.msrb.mxu1 %v2915_v10  ;;  %v2903_v34 = vor.u32 %v3208_v28, %v2900_v29  ;;  %v3007_v26 = vor.u32 %v3233_v12, %v3004_v50  ;;  %v3225_v10 = vld [vmem:[#allocation11 + $0x1ac] sm:$0xf]  ;;  %v2971_v11 = vor.u32 %v3227_v41, %v2970_v9  ;;  %v3187_v15 = vld [vmem:[#allocation11 + $0x74] sm:$0xf0]  ;;  %v2956_v23 = vld [vmem:[#allocation11 + $0x198] sm:$0xf0] }
 0x1a8   :  { %2070 = vst [vmem:[#allocation15] sm:$0xff] %v1224_v56  ;;  %v1236_v6 = vadd.f32 %v1234_v59, %v1224_v56  ;;  %v2843_v56 = vor.u32 %v3195_v55, %v2842_v54  ;;  %v2844_v59 = vld [vmem:[#allocation11 + $0xb8] sm:$0xf0]  ;;  %v2815_v19 = vor.u32 %v3185_v16, %v2812_v18  ;;  %v3181_v28 = vld [vmem:[#allocation11 + $0x4c] sm:$0xf] }
 0x1a9   :  { %v1216_v47 = vsel %vm1215_vm6, %v3673_v17, %v1212_v52  ;;  %v2874_v17 = vld [vmem:[#allocation11 + $0xe8] sm:$0xf]  ;;  %v2847_v60 = vor.u32 %v3193_v46, %v2844_v59  ;;  %v3229_v52 = vld [vmem:[#allocation11 + $0x1cc] sm:$0xf]  ;;  %v2940_v35 = vld [vmem:[#allocation11 + $0x178] sm:$0xf0] }
 0x1aa   :  { %v1218_v45 = vmul.f32 %v1216_v47, %v1194_v3  ;;  %v1238_v39 = vpack.c.bf16 %v1236_v6, %v1236_v6  ;;  %2074 = vst [vmem:[#allocation15 + $0x20] sm:$0xff] %v1236_v6  ;;  %v2875_v20 = vor.u32 %v3203_v14, %v2874_v17  ;;  %1919 = vmatpush.bf16.msrb.mxu2 %v2759_v31  ;;  %v2826_v3 = vld [vmem:[#allocation11 + $0x88] sm:$0xf]  ;;  %v3189_v6 = vld [vmem:[#allocation11 + $0x8c] sm:$0xf] }
 0x1ab   :  { %1905 = vmatpush.bf16.msrb.mxu1 %v2899_v4  ;;  %1931 = vmatpush.bf16.msrb.mxu3 %v2903_v34  ;;  %v2991_v2 = vor.u32 %v3229_v52, %v2988_v1  ;;  %v2828_v47 = vld [vmem:[#allocation11 + $0x98] sm:$0xf0]  ;;  %v3221_v17 = vld [vmem:[#allocation11 + $0x18c] sm:$0xf]  ;;  %v3183_v4 = vld [vmem:[#allocation11 + $0x54] sm:$0xf0] }
 0x1ac   :  { %v1225_v21 = vadd.f32 %v1221_v5, %v1218_v45  ;;  %1445 = vmatmul.bf16.vlgmr.msra.gmra.mxu0 %v1238_v39  ;;  %1471 = vmatmul.bf16.vlgmr.msra.gmra.mxu2 %v1238_v39  ;;  %v3191_v5 = vld [vmem:[#allocation11 + $0x94] sm:$0xf0]  ;;  %v2831_v8 = vor.u32 %v3189_v6, %v2828_v47  ;;  %v2975_v45 = vor.u32 %v3225_v10, %v2972_v13  ;;  %v2810_v39 = vld [vmem:[#allocation11 + $0x68] sm:$0xf]  ;;  %v3177_v57 = vld [vmem:[#allocation11 + $0x2c] sm:$0xf] }
 0x1ad   :  { %1938 = vmatpush.bf16.msra.mxu0 %v2875_v20  ;;  %v2827_v7 = vor.u32 %v3191_v5, %v2826_v3  ;;  %v2811_v49 = vor.u32 %v3187_v15, %v2810_v39  ;;  %v2959_v24 = vor.u32 %v3221_v17, %v2956_v23  ;;  %v2795_v29 = vor.u32 %v3183_v4, %v2794_v25  ;;  %v2938_v20 = vld [vmem:[#allocation11 + $0x168] sm:$0xf]  ;;  %v2780_v62 = vld [vmem:[#allocation11 + $0x38] sm:$0xf0]  ;;  %v3175_v50 = vld [vmem:[#allocation11 + $0x14] sm:$0xf0] }
 0x1ae   :  { %2071 = vst [vmem:[#allocation15 + $0x8] sm:$0xff] %v1225_v21  ;;  %v1237_v30 = vadd.f32 %v1235_v22, %v1225_v21  ;;  %1964 = vmatpush.bf16.msra.mxu2 %v2879_v33  ;;  %v2954_v21 = vld [vmem:[#allocation11 + $0x188] sm:$0xf]  ;;  %v3223_v22 = vld [vmem:[#allocation11 + $0x194] sm:$0xf0]  ;;  %v2783_v27 = vor.u32 %v3177_v57, %v2780_v62 }
 0x1af   :  { %1906 = vmatpush.bf16.msrb.mxu1 %v2883_v53  ;;  %1932 = vmatpush.bf16.msrb.mxu3 %v2887_v44  ;;  %v2955_v14 = vor.u32 %v3223_v22, %v2954_v21  ;;  %v3217_v33 = vld [vmem:[#allocation11 + $0x16c] sm:$0xf]  ;;  %v3215_v53 = vld [vmem:[#allocation11 + $0x154] sm:$0xf0]  ;;  %v2924_v44 = vld [vmem:[#allocation11 + $0x158] sm:$0xf0] }
 0x1b0   :  { %v1239_v32 = vpack.c.bf16 %v1237_v30, %v1237_v30  ;;  %2075 = vst [vmem:[#allocation15 + $0x28] sm:$0xff] %v1237_v30  ;;  %v2796_v30 = vld [vmem:[#allocation11 + $0x58] sm:$0xf0]  ;;  %v2943_v36 = vor.u32 %v3217_v33, %v2940_v35  ;;  %v2762_v58 = vld [vmem:[#allocation11 + $0x8] sm:$0xf]  ;;  %v2927_v12 = vor.u32 %v3213_v43, %v2924_v44 }
 0x1b1   :  { %1939 = vmatpush.bf16.msra.mxu0 %v2859_v38  ;;  %v2799_v31 = vor.u32 %v3181_v28, %v2796_v30  ;;  %v3179_v38 = vld [vmem:[#allocation11 + $0x34] sm:$0xf0]  ;;  %v2763_v54 = vor.u32 %v3175_v50, %v2762_v58  ;;  %v2906_v46 = vld [vmem:[#allocation11 + $0x128] sm:$0xf]  ;;  %v3209_v59 = vld [vmem:[#allocation11 + $0x12c] sm:$0xf] }
 0x1b2   :  { %1458 = vmatmul.bf16.vlgmr.msra.gmra.mxu1 %v1239_v32  ;;  %1484 = vmatmul.bf16.vlgmr.msra.gmra.mxu3 %v1239_v32  ;;  %v3219_v32 = vld [vmem:[#allocation11 + $0x174] sm:$0xf0]  ;;  %v2779_v40 = vor.u32 %v3179_v38, %v2778_v37  ;;  %v3205_v1 = vld [vmem:[#allocation11 + $0x10c] sm:$0xf]  ;;  %v2892_v5 = vld [vmem:[#allocation11 + $0x118] sm:$0xf0] }
 0x1b3   :  { %1965 = vmatpush.bf16.msra.mxu2 %v2863_v42  ;;  %1951 = vmatpush.bf16.msra.mxu1 %v3003_v51  ;;  %v2939_v34 = vor.u32 %v3219_v32, %v2938_v20  ;;  %v2922_v42 = vld [vmem:[#allocation11 + $0x148] sm:$0xf]  ;;  %v3173_v51 = vld [vmem:[#allocation11 + $0xc] sm:$0xf]  ;;  %v3207_v52 = vld [vmem:[#allocation11 + $0x114] sm:$0xf0]  ;;  %v2895_v6 = vor.u32 %v3205_v1, %v2892_v5 }
 0x1b4   :  { %1977 = vmatpush.bf16.msra.mxu3 %v3007_v26  ;;  %v2923_v48 = vor.u32 %v3215_v53, %v2922_v42  ;;  %v2764_v26 = vld [vmem:[#allocation11 + $0x18] sm:$0xf0]  ;;  %2097 = dma.vmem_to_hbm [thread:$0]  %s2093_s6, 768, %s2095_s1, [#allocation16]  }
 0x1b5   :  { %1940 = vmatpush.bf16.msra.mxu0 %v2843_v56  ;;  %v2767_v55 = vor.u32 %v3173_v51, %v2764_v26  ;;  %v3211_v56 = vld [vmem:[#allocation11 + $0x134] sm:$0xf0] }
 0x1b6   :  { %v2907_v61 = vor.u32 %v3211_v56, %v2906_v46 }
 0x1b7   :  { %1966 = vmatpush.bf16.msra.mxu2 %v2847_v60  ;;  %1952 = vmatpush.bf16.msra.mxu1 %v2987_v0  ;;  %v2908_v60 = vld [vmem:[#allocation11 + $0x138] sm:$0xf0]  ;;  %v2890_v0 = vld [vmem:[#allocation11 + $0x108] sm:$0xf] }
 0x1b8   :  { %1978 = vmatpush.bf16.msra.mxu3 %v2991_v2  ;;  %v2911_v63 = vor.u32 %v3209_v59, %v2908_v60  ;;  %v137_v2 = vld [vmem:[#allocation13 + $0xa] sm:$0x3]  ;;  %v2891_v3 = vor.u32 %v3207_v52, %v2890_v0 }
 0x1b9   :  { %1941 = vmatpush.bf16.msra.mxu0 %v2827_v7  ;;  %v1273_v47 = vperm.slane %v137_v2, 0 }
 0x1bb   :  { %1967 = vmatpush.bf16.msra.mxu2 %v2831_v8  ;;  %1953 = vmatpush.bf16.msra.mxu1 %v2971_v11  ;;  %v1274_v11 = vperm.slane %v137_v2, 1 }
 0x1bc   :  { %1979 = vmatpush.bf16.msra.mxu3 %v2975_v45 }
 0x1bd   :  { %1942 = vmatpush.bf16.msra.mxu0 %v2811_v49 }
 0x1bf   :  { %1968 = vmatpush.bf16.msra.mxu2 %v2815_v19  ;;  %1954 = vmatpush.bf16.msra.mxu1 %v2955_v14  ;;  %v138_v14 = vld [vmem:[#allocation13 + $0xc] sm:$0xf] }
 0x1c0   :  { %1980 = vmatpush.bf16.msra.mxu3 %v2959_v24  ;;  %v1558_v24 = vperm.slane %v138_v14, 0  ;;  %v1559_v30 = vperm.slane %v138_v14, 1  ;;  %v1561_v58 = vperm.slane %v138_v14, 3 }
 0x1c1   :  { %1943 = vmatpush.bf16.msra.mxu0 %v2795_v29 }
 0x1c3   :  { %1969 = vmatpush.bf16.msra.mxu2 %v2799_v31  ;;  %1955 = vmatpush.bf16.msra.mxu1 %v2939_v34 }
 0x1c4   :  { %1981 = vmatpush.bf16.msra.mxu3 %v2943_v36 }
 0x1c5   :  { %1944 = vmatpush.bf16.msra.mxu0 %v2779_v40  ;;  %v1560_v40 = vperm.slane %v138_v14, 2 }
 0x1c7   :  { %1970 = vmatpush.bf16.msra.mxu2 %v2783_v27  ;;  %1956 = vmatpush.bf16.msra.mxu1 %v2923_v48 }
 0x1c8   :  { %1982 = vmatpush.bf16.msra.mxu3 %v2927_v12 }
 0x1c9   :  { %1945 = vmatpush.bf16.msra.mxu0 %v2763_v54 }
 0x1cb   :  { %1971 = vmatpush.bf16.msra.mxu2 %v2767_v55  ;;  %1957 = vmatpush.bf16.msra.mxu1 %v2907_v61 }
 0x1cc   :  { %1983 = vmatpush.bf16.msra.mxu3 %v2911_v63 }
 0x1cf   :  { %1958 = vmatpush.bf16.msra.mxu1 %v2891_v3 }
 0x1d0   :  { %1984 = vmatpush.bf16.msra.mxu3 %v2895_v6 }
 0x229   :  { %v1446_v7 = vpop.f32.mrf.mxu0 }
 0x22a   :  { %v1447_v8 = vadd.f32 %v1446_v7, %v1273_v47 }
 0x22f   :  { %v1459_v9 = vpop.f32.mrf.mxu1  ;;  %v1472_v41 = vpop.f32.mrf.mxu2 }
 0x230   :  { %v1460_v10 = vadd.f32 %v1459_v9, %v1447_v8  ;;  %v1473_v15 = vadd.f32 %v1472_v41, %v1274_v11 }
 0x231   :  { %v1448_v13 = vpop.f32.mrf.mxu0 }
 0x232   :  { %v1489_v45 = vmax.f32 %v1460_v10, 0.0 }
 0x234   :  { %v1491_v39 = vpack.c.bf16 %v1489_v45, %v1489_v45 }
 0x235   :  { %v1485_v16 = vpop.f32.mrf.mxu3 }
 0x236   :  { %v1486_v49 = vadd.f32 %v1485_v16, %v1473_v15  ;;  %1894 = vmatmul.bf16.vlgmr.msrb.gmra.mxu0 %v1491_v39  ;;  %1920 = vmatmul.bf16.vlgmr.msrb.gmra.mxu2 %v1491_v39 }
 0x237   :  { %v1461_v18 = vpop.f32.mrf.mxu1  ;;  %v1474_v19 = vpop.f32.mrf.mxu2 }
 0x238   :  { %v1490_v21 = vmax.f32 %v1486_v49, 0.0 }
 0x23a   :  { %v1492_v22 = vpack.c.bf16 %v1490_v21, %v1490_v21 }
 0x23c   :  { %1907 = vmatmul.bf16.vlgmr.msrb.gmra.mxu1 %v1492_v22  ;;  %1933 = vmatmul.bf16.vlgmr.msrb.gmra.mxu3 %v1492_v22 }
 0x23d   :  { %v1487_v17 = vpop.f32.mrf.mxu3 }
 0x246   :  { %1946 = vmatmul.bf16.vlgmr.msra.gmra.mxu0 %v1491_v39  ;;  %1972 = vmatmul.bf16.vlgmr.msra.gmra.mxu2 %v1491_v39 }
 0x24c   :  { %1959 = vmatmul.bf16.vlgmr.msra.gmra.mxu1 %v1492_v22  ;;  %1985 = vmatmul.bf16.vlgmr.msra.gmra.mxu3 %v1492_v22 }
 0x2b3   :  { %v1895_v23 = vpop.f32.mrf.mxu0 }
 0x2b4   :  { %v1896_v25 = vadd.f32 %v1895_v23, %v1558_v24 }
 0x2b9   :  { %v1908_v4 = vpop.f32.mrf.mxu1  ;;  %v1921_v28 = vpop.f32.mrf.mxu2 }
 0x2ba   :  { %v1909_v29 = vadd.f32 %v1908_v4, %v1896_v25  ;;  %v1922_v32 = vadd.f32 %v1921_v28, %v1559_v30 }
 0x2bb   :  { %v1897_v31 = vpop.f32.mrf.mxu0 }
 0x2bc   :  { %v3008_v20 = vmul.f32 -1.442695, %v1909_v29 }
 0x2be   :  { %3260 = vpow2.f32 %v3008_v20 }
 0x2bf   :  { %v1934_v33 = vpop.f32.mrf.mxu3 }
 0x2c0   :  { %v1935_v34 = vadd.f32 %v1934_v33, %v1922_v32 }
 0x2c1   :  { %v1910_v35 = vpop.f32.mrf.mxu1  ;;  %v1923_v36 = vpop.f32.mrf.mxu2 }
 0x2c2   :  { %v3009_v37 = vmul.f32 -1.442695, %v1935_v34 }
 0x2c3   :  { %v1947_v38 = vpop.f32.mrf.mxu0 }
 0x2c4   :  { %v3261_v57 = vpop.eup %3260  ;;  %3262 = vpow2.f32 %v3009_v37  ;;  %v1948_v53 = vadd.f32 %v1947_v38, %v1560_v40 }
 0x2c5   :  { %v2002_v62 = vadd.f32 1.0, %v3261_v57 }
 0x2c7   :  { %3264 = vrcp.f32 %v2002_v62  ;;  %v1936_v42 = vpop.f32.mrf.mxu3  ;;  %v2017_v60 = vand.u32 2147483648, %v2002_v62  ;;  %v2015_v1 = vand.u32 2147483647, %v2002_v62  ;;  %vm2011_vm8 = vweird.f32 %v2002_v62 }
 0x2c9   :  { %v1960_v27 = vpop.f32.mrf.mxu1  ;;  %v1973_v48 = vpop.f32.mrf.mxu2  ;;  %v2018_v7 = vor.u32 1.1754944e-38, %v2017_v60  ;;  %vm2016_vm10 = vcmp.eq.f32.partialorder %v2015_v1, 8.507059e+37 }
 0x2ca   :  { %v3263_v43 = vpop.eup %3262  ;;  %v1961_v44 = vadd.f32 %v1960_v27, %v1948_v53  ;;  %v1974_v55 = vadd.f32 %v1973_v48, %v1561_v58 }
 0x2cb   :  { %v2003_v12 = vadd.f32 1.0, %v3263_v43  ;;  %v1949_v50 = vpop.f32.mrf.mxu0 }
 0x2cc   :  { %v3010_v51 = vmul.f32 -1.442695, %v1961_v44 }
 0x2cd   :  { %v3265_v26 = vpop.eup %3264  ;;  %3266 = vrcp.f32 %v2003_v12  ;;  %v2032_v41 = vand.u32 2147483648, %v2003_v12  ;;  %v2030_v45 = vand.u32 2147483647, %v2003_v12  ;;  %vm2026_vm12 = vweird.f32 %v2003_v12 }
 0x2ce   :  { %v2007_v54 = vmul.f32 %v3265_v26, %v2002_v62  ;;  %3268 = vpow2.f32 %v3010_v51  ;;  %vm2012_vm7 = vweird.f32 %v3265_v26 }
 0x2cf   :  { %v1986_v46 = vpop.f32.mrf.mxu3  ;;  %vm2013_vm9 = vmor %vm2011_vm8, %vm2012_vm7  ;;  %v2033_v16 = vor.u32 1.1754944e-38, %v2032_v41  ;;  %vm2031_vm14 = vcmp.eq.f32.partialorder %v2030_v45, 8.507059e+37 }
 0x2d0   :  { %v2008_v56 = vsub.f32 1.0, %v2007_v54  ;;  %v1987_v59 = vadd.f32 %v1986_v46, %v1974_v55 }
 0x2d1   :  { %v1962_v61 = vpop.f32.mrf.mxu1  ;;  %v1975_v63 = vpop.f32.mrf.mxu2 }
 0x2d2   :  { %v2009_v0 = vmul.f32 %v3265_v26, %v2008_v56  ;;  %v3011_v52 = vmul.f32 -1.442695, %v1987_v59 }
 0x2d3   :  { %v3267_v2 = vpop.eup %3266 }
 0x2d4   :  { %v3269_v3 = vpop.eup %3268  ;;  %v2022_v5 = vmul.f32 %v3267_v2, %v2003_v12  ;;  %3270 = vpow2.f32 %v3011_v52  ;;  %v2010_v6 = vadd.f32 %v3265_v26, %v2009_v0  ;;  %vm2027_vm11 = vweird.f32 %v3267_v2 }
 0x2d5   :  { %v2004_v47 = vadd.f32 1.0, %v3269_v3  ;;  %vm2028_vm13 = vmor %vm2026_vm12, %vm2027_vm11 }
 0x2d6   :  { %v2023_v8 = vsub.f32 1.0, %v2022_v5  ;;  %v2014_v9 = vsel %vm2013_vm9, %v3265_v26, %v2010_v6 }
 0x2d7   :  { %3272 = vrcp.f32 %v2004_v47  ;;  %v1988_v10 = vpop.f32.mrf.mxu3  ;;  %v2019_v11 = vsel %vm2016_vm10, %v2018_v7, %v2014_v9  ;;  %v2047_v14 = vand.u32 2147483648, %v2004_v47  ;;  %v2045_v24 = vand.u32 2147483647, %v2004_v47 }
 0x2d8   :  { %v2024_v13 = vmul.f32 %v3267_v2, %v2023_v8  ;;  %2066 = vst [vmem:[#allocation14] sm:$0xff] %v2019_v11  ;;  %vm2041_vm0 = vweird.f32 %v2004_v47 }
 0x2d9   :  { %v2048_v29 = vor.u32 1.1754944e-38, %v2047_v14  ;;  %vm2046_vm2 = vcmp.eq.f32.partialorder %v2045_v24, 8.507059e+37 }
 0x2da   :  { %v3271_v39 = vpop.eup %3270  ;;  %v2025_v15 = vadd.f32 %v3267_v2, %v2024_v13 }
 0x2db   :  { %v2005_v49 = vadd.f32 1.0, %v3271_v39 }
 0x2dc   :  { %v2029_v18 = vsel %vm2028_vm13, %v3267_v2, %v2025_v15 }
 0x2dd   :  { %v3273_v19 = vpop.eup %3272  ;;  %3274 = vrcp.f32 %v2005_v49  ;;  %v2034_v21 = vsel %vm2031_vm14, %v2033_v16, %v2029_v18  ;;  %v2062_v20 = vand.u32 2147483648, %v2005_v49  ;;  %v2060_v34 = vand.u32 2147483647, %v2005_v49 }
 0x2de   :  { %v2037_v22 = vmul.f32 %v3273_v19, %v2004_v47  ;;  %2067 = vst [vmem:[#allocation14 + $0x8] sm:$0xff] %v2034_v21  ;;  %vm2042_vm15 = vweird.f32 %v3273_v19  ;;  %vm2056_vm4 = vweird.f32 %v2005_v49 }
 0x2df   :  { %vm2043_vm1 = vmor %vm2041_vm0, %vm2042_vm15  ;;  %v2063_v36 = vor.u32 1.1754944e-38, %v2062_v20  ;;  %vm2061_vm6 = vcmp.eq.f32.partialorder %v2060_v34, 8.507059e+37 }
 0x2e0   :  { %v2038_v17 = vsub.f32 1.0, %v2037_v22 }
 0x2e2   :  { %v2039_v23 = vmul.f32 %v3273_v19, %v2038_v17 }
 0x2e3   :  { %v3275_v25 = vpop.eup %3274 }
 0x2e4   :  { %v2052_v4 = vmul.f32 %v3275_v25, %v2005_v49  ;;  %v2040_v28 = vadd.f32 %v3273_v19, %v2039_v23  ;;  %vm2057_vm3 = vweird.f32 %v3275_v25 }
 0x2e5   :  { %vm2058_vm5 = vmor %vm2056_vm4, %vm2057_vm3 }
 0x2e6   :  { %v2053_v30 = vsub.f32 1.0, %v2052_v4  ;;  %v2044_v31 = vsel %vm2043_vm1, %v3273_v19, %v2040_v28 }
 0x2e7   :  { %v2049_v32 = vsel %vm2046_vm2, %v2048_v29, %v2044_v31 }
 0x2e8   :  { %v2054_v33 = vmul.f32 %v3275_v25, %v2053_v30  ;;  %2068 = vst [vmem:[#allocation14 + $0x10] sm:$0xff] %v2049_v32 }
 0x2ea   :  { %v2055_v35 = vadd.f32 %v3275_v25, %v2054_v33 }
 0x2ec   :  { %v2059_v37 = vsel %vm2058_vm5, %v3275_v25, %v2055_v35 }
 0x2ed   :  { %v2064_v38 = vsel %vm2061_vm6, %v2063_v36, %v2059_v37 }
 0x2ee   :  { %2069 = vst [vmem:[#allocation14 + $0x18] sm:$0xff] %v2064_v38 }
 0x2ef   :  { %2086 = dma.vmem_to_hbm [thread:$0]  %s2082_s19, 512, %s2084_s22, [#allocation4]  }
 0x2f0   :  { %3500 = dma.done.wait [#allocation4], 512  }
 0x2f1   :  { %3501 = vsyncadd [#allocation4], 4294966784 }
 0x2f2   :  { %3502 = dma.done.wait [#allocation16], 768  }
 0x2f3   :  { %3503 = vsyncadd [#allocation16], 4294966528 }
 0x2f4   :  { %2106 = vsyncpa [#allocation3], 1 }
 0x2f5   :  { %2107 = vsyncpa [#allocation6], 1 }
 0x2f6   :  { %2108 = vsyncpa [#allocation9], 1 }
 0x2f7   :  { %2109 = vsyncpa [#allocation12], 1 }
 0x2f8   :  { %2110 = vsyncpa [#allocation4], 1 }
 0x2f9   :  { %2111 = vsyncpa [#allocation16], 1 }

</bundles_post_ra>
